<compile_context>
chip_gen: v6e
topology: v6e:2x2x1
jax: 0.10.0
libtpu: 0.0.40
codegen_flags: <defaults>
</compile_context>

<pallas_src>
import jax
import jax.numpy as jnp
from jax import lax
from jax.experimental import pallas as pl
from jax.experimental.pallas import tpu as pltpu

# ---- small config consistent with SubjBasisGenerator defaults (scaled down) ----
B, N_CLIP = 2, 8     # batch, clip feature sequence length
E = 256              # image_embedding_dim
D = 384              # output_dim (divisible by num_heads and by 128)
H = 6                # num_heads
DH = D // H          # dim_head = 64
L = 16               # num_latent_queries
Q = 16               # num_out_queries (hira_rank)
M = 4                # num_lora2hira_modes
DEPTH = 1
EPS = 1e-5
OUT_SCALE = D ** -0.5


def _ln_rows(x, g, b):
    """LayerNorm over the last (lane) axis; g/b are (1, D)."""
    mu = jnp.mean(x, axis=-1, keepdims=True)
    var = jnp.mean((x - mu) ** 2, axis=-1, keepdims=True)
    return (x - mu) * lax.rsqrt(var + EPS) * g + b


# ------------------------------- fused kernel -----------------------------------

def fused_kernel(x_ref, wpi_ref, gpi_ref, bpi_ref,
                 q3_ref, weff_ref,
                 wl2h_ref, gl_ref, bl_ref, ws_ref,
                 o_ref):
    # ---- stage 1: proj_in = Linear(E->D, no bias) + LayerNorm(D) ----
    x = x_ref[0]                                                          # (N_CLIP, E)
    hpi = jnp.dot(x, wpi_ref[...], preferred_element_type=jnp.float32)    # (N_CLIP, D)
    ctx = _ln_rows(hpi, gpi_ref[...], bpi_ref[...])                       # (N_CLIP, D)

    # ---- stage 2: DEPTH x CrossAttention (identity q/k/v; to_out+skip folded) ----
    for dep in range(DEPTH):                                              # static unroll
        n_ctx = ctx.shape[0]
        q3 = q3_ref[dep]                                                  # (H, L, DH), pre-LN'd, pre-scaled DH^-0.5
        # heads of context: k == v == ctx. 2D transpose + major-dim split (tile aligned).
        k3 = ctx.T.reshape(H, DH, n_ctx)                                  # (H, DH, N)
        sim = jnp.einsum('hld,hdn->hln', q3, k3,
                         preferred_element_type=jnp.float32)              # (H, L, N)
        sim = sim - jnp.max(sim, axis=-1, keepdims=True)
        e = jnp.exp(sim)
        p = e * pl.reciprocal(jnp.sum(e, axis=-1, keepdims=True), approx=True)
        out3 = jnp.einsum('hln,hdn->hld', p, k3,
                          preferred_element_type=jnp.float32)             # (H, L, DH)
        # re-assemble heads (leading-dim index is free; single lane concat of 24 KiB)
        out = jnp.concatenate([out3[h] for h in range(H)], axis=-1)       # (L, D)
        # to_out(out) + out  ==  out @ (W_out + I), one full-width MXU matmul
        ctx = jnp.dot(out, weff_ref[dep], preferred_element_type=jnp.float32)  # (L, D)
        # use_FFN=False -> ff is nn.Identity -> no-op

    # ---- stage 3: Lora2Hira + LearnedSoftAggregate + output_scale ----
    # single (M*Q, L) @ (L, D) matmul replaces the per-mode loop
    y = jnp.dot(wl2h_ref[...], ctx, preferred_element_type=jnp.float32)   # (M*Q, D)
    yn = _ln_rows(y, gl_ref[...], bl_ref[...])                            # (M*Q, D)
    yn3 = yn.reshape(M, Q, D)                                             # major-dim split (free)
    # scores via VPU multiply + lane reduce (no (D,1) matmul)
    scores = jnp.sum(yn3 * ws_ref[...], axis=-1)                          # (M, Q)
    st = scores.T                                                         # (Q, M)
    st = st - jnp.max(st, axis=-1, keepdims=True)
    se = jnp.exp(st)
    pm = se * pl.reciprocal(jnp.sum(se, axis=-1, keepdims=True), approx=True)  # (Q, M)
    agg = yn3[0] * pm[:, 0:1]
    for m in range(1, M):                                                 # M=4 VPU FMAs
        agg = agg + yn3[m] * pm[:, m:m + 1]
    o_ref[0] = agg * OUT_SCALE


# ------------------------------- wrapper -----------------------------------------

def subj_basis_generator_forward(clip_features, p):
    # ---- parameter-only preprocessing hoisted out of the kernel ----
    eye = jnp.eye(D, dtype=jnp.float32)
    q3_layers, weff_layers = [], []
    for i in range(DEPTH):
        lqn = _ln_rows(p['latents'][i], p['g_lq'][i], p['b_lq'][i])        # (L, D), LN of latents
        # fold both DH^-0.25 scales into q; split heads: (L, D) -> (H, L, DH)
        q3 = (lqn * (DH ** -0.5)).reshape(L, H, DH).transpose(1, 0, 2)
        q3_layers.append(q3)
        # fold residual skip into the to_out weight: out @ W_out + out == out @ (W_out + I)
        weff_layers.append(p['W_out'][i] + eye)
    q3_all = jnp.stack(q3_layers)                                          # (DEPTH, H, L, DH)
    weff_all = jnp.stack(weff_layers)                                      # (DEPTH, D, D)
    wl2h_t = p['W_l2h'].T                                                  # (M*Q, L)
    ws_row = p['W_score'].T                                                # (1, D)

    return pl.pallas_call(
        fused_kernel,
        out_shape=jax.ShapeDtypeStruct((B, Q, D), jnp.float32),
        grid=(B,),
        in_specs=[
            pl.BlockSpec((1, N_CLIP, E), lambda i: (i, 0, 0)),             # clip features (per batch)
            pl.BlockSpec((E, D), lambda i: (0, 0)),                        # W_pi
            pl.BlockSpec((1, D), lambda i: (0, 0)),                        # g_pi
            pl.BlockSpec((1, D), lambda i: (0, 0)),                        # b_pi
            pl.BlockSpec((DEPTH, H, L, DH), lambda i: (0, 0, 0, 0)),       # pre-LN'd, pre-split latents
            pl.BlockSpec((DEPTH, D, D), lambda i: (0, 0, 0)),              # W_out + I
            pl.BlockSpec((M * Q, L), lambda i: (0, 0)),                    # W_l2h^T
            pl.BlockSpec((1, D), lambda i: (0, 0)),                        # g_l2h
            pl.BlockSpec((1, D), lambda i: (0, 0)),                        # b_l2h
            pl.BlockSpec((1, D), lambda i: (0, 0)),                        # W_score^T
        ],
        out_specs=pl.BlockSpec((1, Q, D), lambda i: (i, 0, 0)),
        compiler_params=pltpu.CompilerParams(
            dimension_semantics=("parallel",)),                            # 1 batch / TC on v7x
    )(clip_features, p['W_pi'], p['g_pi'], p['b_pi'],
      q3_all, weff_all, wl2h_t, p['g_l2h'], p['b_l2h'], ws_row)


# ------------------------------- pure-JAX reference -----------------------------

def _ln(x, g, b):
    mu = x.mean(-1, keepdims=True)
    var = ((x - mu) ** 2).mean(-1, keepdims=True)
    return (x - mu) / jnp.sqrt(var + EPS) * g + b


def reference_forward(clip, p):
    x = _ln(clip @ p['W_pi'], p['g_pi'][0], p['b_pi'][0])          # (B, N, D)
    ctx = x
    for i in range(DEPTH):
        lq = _ln(p['latents'][i], p['g_lq'][i][0], p['b_lq'][i][0])
        q = jnp.broadcast_to(lq, (B, L, D))
        qh = q.reshape(B, L, H, DH).transpose(0, 2, 1, 3).reshape(B * H, L, DH)
        kh = ctx.reshape(B, -1, H, DH).transpose(0, 2, 1, 3).reshape(B * H, -1, DH)
        vh = kh
        scale = DH ** (-0.25)
        sim = jnp.einsum('bid,bjd->bij', qh * scale, kh * scale)
        attn = jax.nn.softmax(sim, axis=-1)
        out = jnp.einsum('bij,bjd->bid', attn, vh)
        out = out.reshape(B, H, L, DH).transpose(0, 2, 1, 3).reshape(B, L, D)
        ctx = out @ p['W_out'][i] + out
    y = jnp.einsum('bld,lk->bdk', ctx, p['W_l2h'])                 # (B, D, M*Q)
    y = y.reshape(B, D, M, Q).transpose(0, 2, 3, 1)                # (B, M, Q, D)
    yn = _ln(y, p['g_l2h'][0], p['b_l2h'][0])
    scores = yn @ p['W_score']                                     # (B, M, Q, 1)
    probs = jax.nn.softmax(scores, axis=1)
    agg = (yn * probs).sum(axis=1)                                 # (B, Q, D)
    return agg * OUT_SCALE


# ------------------------------- main -------------------------------------------

if __name__ == "__main__":
    key = jax.random.PRNGKey(0)
    ks = jax.random.split(key, 16)

    params = {
        'W_pi':   jax.random.normal(ks[0], (E, D), jnp.float32) * E ** -0.5,
        'g_pi':   1.0 + 0.1 * jax.random.normal(ks[1], (1, D), jnp.float32),
        'b_pi':   0.02 * jax.random.normal(ks[2], (1, D), jnp.float32),
        'latents': [jax.random.normal(ks[3], (L, D), jnp.float32) * D ** -0.5],
        'g_lq':   [1.0 + 0.1 * jax.random.normal(ks[4], (1, D), jnp.float32)],
        'b_lq':   [0.02 * jax.random.normal(ks[5], (1, D), jnp.float32)],
        'W_out':  [jax.random.normal(ks[6], (D, D), jnp.float32) * D ** -0.5],
        'W_l2h':  jax.random.normal(ks[7], (L, M * Q), jnp.float32) * L ** -0.5,
        'g_l2h':  1.0 + 0.1 * jax.random.normal(ks[8], (1, D), jnp.float32),
        'b_l2h':  0.02 * jax.random.normal(ks[9], (1, D), jnp.float32),
        'W_score': jax.random.normal(ks[10], (D, 1), jnp.float32) * D ** -0.5,
    }

    clip_features = jax.random.normal(ks[11], (B, N_CLIP, E), jnp.float32)

    fwd = jax.jit(subj_basis_generator_forward)
    out = fwd(clip_features, params)
    out = jax.block_until_ready(out)

    ref = reference_forward(clip_features, params)
    assert out.shape == (B, Q, D), out.shape
    # tolerance slightly loosened vs. exact-divide version because softmax denominators
    # use pl.reciprocal(approx=True); real layout/indexing bugs give errors >> 1e-2.
    assert jnp.allclose(out, ref, atol=3e-3, rtol=3e-3), float(jnp.max(jnp.abs(out - ref)))

    print("KERNEL_OK")
</pallas_src>

<mosaic_0001>
module attributes {stable_mosaic.version = 11 : i64} {
  func.func @fused_kernel(%arg0: i32, %arg1: memref<1x8x256xf32, #tpu.memory_space<vmem>>, %arg2: memref<256x384xf32, #tpu.memory_space<vmem>>, %arg3: memref<1x384xf32, #tpu.memory_space<vmem>>, %arg4: memref<1x384xf32, #tpu.memory_space<vmem>>, %arg5: memref<1x6x16x64xf32, #tpu.memory_space<vmem>>, %arg6: memref<1x384x384xf32, #tpu.memory_space<vmem>>, %arg7: memref<64x16xf32, #tpu.memory_space<vmem>>, %arg8: memref<1x384xf32, #tpu.memory_space<vmem>>, %arg9: memref<1x384xf32, #tpu.memory_space<vmem>>, %arg10: memref<1x384xf32, #tpu.memory_space<vmem>>, %arg11: memref<1x16x384xf32, #tpu.memory_space<vmem>>) attributes {dimension_semantics = [#tpu.dimension_semantics<parallel>], iteration_bounds = array<i64: 2>, scalar_prefetch = 0 : i64, scratch_operands = 0 : i64, tpu.core_type = #tpu.core_type<tc>, window_params = [{transform_indices = @transform_0, window_bounds = array<i64: 1, 8, 256>}, {pipeline_mode = #tpu.pipeline_mode<synchronous>, transform_indices = @transform_1, window_bounds = array<i64: 256, 384>}, {pipeline_mode = #tpu.pipeline_mode<synchronous>, transform_indices = @transform_2, window_bounds = array<i64: 1, 384>}, {pipeline_mode = #tpu.pipeline_mode<synchronous>, transform_indices = @transform_3, window_bounds = array<i64: 1, 384>}, {pipeline_mode = #tpu.pipeline_mode<synchronous>, transform_indices = @transform_4, window_bounds = array<i64: 1, 6, 16, 64>}, {pipeline_mode = #tpu.pipeline_mode<synchronous>, transform_indices = @transform_5, window_bounds = array<i64: 1, 384, 384>}, {pipeline_mode = #tpu.pipeline_mode<synchronous>, transform_indices = @transform_6, window_bounds = array<i64: 64, 16>}, {pipeline_mode = #tpu.pipeline_mode<synchronous>, transform_indices = @transform_7, window_bounds = array<i64: 1, 384>}, {pipeline_mode = #tpu.pipeline_mode<synchronous>, transform_indices = @transform_8, window_bounds = array<i64: 1, 384>}, {pipeline_mode = #tpu.pipeline_mode<synchronous>, transform_indices = @transform_9, window_bounds = array<i64: 1, 384>}, {transform_indices = @transform_10, window_bounds = array<i64: 1, 16, 384>}]} {
    %c0 = arith.constant 0 : index
    %c0_0 = arith.constant 0 : index
    %c0_1 = arith.constant 0 : index
    %0 = vector.load %arg1[%c0, %c0_0, %c0_1] : memref<1x8x256xf32, #tpu.memory_space<vmem>>, vector<1x8x256xf32>
    %1 = vector.shape_cast %0 : vector<1x8x256xf32> to vector<8x256xf32>
    %c0_2 = arith.constant 0 : index
    %c0_3 = arith.constant 0 : index
    %2 = vector.load %arg2[%c0_2, %c0_3] : memref<256x384xf32, #tpu.memory_space<vmem>>, vector<256x384xf32>
    %cst = arith.constant dense<0.000000e+00> : vector<8x384xf32>
    %3 = tpu.matmul %1, %2, %cst {dimension_numbers = #tpu.dot_dimension_numbers<[1], [0], [0], [1], [0, 0, 1, 1], [], []>} : vector<8x256xf32>, vector<256x384xf32>, vector<8x384xf32> -> vector<8x384xf32>
    %c0_4 = arith.constant 0 : index
    %c0_5 = arith.constant 0 : index
    %4 = vector.load %arg3[%c0_4, %c0_5] : memref<1x384xf32, #tpu.memory_space<vmem>>, vector<1x384xf32>
    %c0_6 = arith.constant 0 : index
    %c0_7 = arith.constant 0 : index
    %5 = vector.load %arg4[%c0_6, %c0_7] : memref<1x384xf32, #tpu.memory_space<vmem>>, vector<1x384xf32>
    %cst_8 = arith.constant dense<0.000000e+00> : vector<8xf32>
    %6 = vector.multi_reduction <add>, %3, %cst_8 [1] : vector<8x384xf32> to vector<8xf32>
    %7 = vector.shape_cast %6 : vector<8xf32> to vector<8x1xf32>
    %cst_9 = arith.constant 3.840000e+02 : f32
    %8 = vector.broadcast %cst_9 : f32 to vector<8x1xf32>
    %9 = arith.divf %7, %8 : vector<8x1xf32>
    %10 = vector.broadcast %9 : vector<8x1xf32> to vector<8x384xf32>
    %11 = arith.subf %3, %10 : vector<8x384xf32>
    %12 = arith.mulf %11, %11 : vector<8x384xf32>
    %cst_10 = arith.constant dense<0.000000e+00> : vector<8xf32>
    %13 = vector.multi_reduction <add>, %12, %cst_10 [1] : vector<8x384xf32> to vector<8xf32>
    %14 = vector.shape_cast %13 : vector<8xf32> to vector<8x1xf32>
    %cst_11 = arith.constant 3.840000e+02 : f32
    %15 = vector.broadcast %cst_11 : f32 to vector<8x1xf32>
    %16 = arith.divf %14, %15 : vector<8x1xf32>
    %17 = vector.broadcast %9 : vector<8x1xf32> to vector<8x384xf32>
    %18 = arith.subf %3, %17 : vector<8x384xf32>
    %cst_12 = arith.constant 9.99999974E-6 : f32
    %19 = vector.broadcast %cst_12 : f32 to vector<8x1xf32>
    %20 = arith.addf %16, %19 : vector<8x1xf32>
    %21 = math.rsqrt %20 : vector<8x1xf32>
    %22 = vector.broadcast %21 : vector<8x1xf32> to vector<8x384xf32>
    %23 = arith.mulf %18, %22 : vector<8x384xf32>
    %24 = vector.broadcast %4 : vector<1x384xf32> to vector<8x384xf32>
    %25 = arith.mulf %23, %24 : vector<8x384xf32>
    %26 = vector.broadcast %5 : vector<1x384xf32> to vector<8x384xf32>
    %27 = arith.addf %25, %26 : vector<8x384xf32>
    %c0_13 = arith.constant 0 : index
    %c0_14 = arith.constant 0 : index
    %c0_15 = arith.constant 0 : index
    %c0_16 = arith.constant 0 : index
    %28 = vector.load %arg5[%c0_13, %c0_14, %c0_15, %c0_16] : memref<1x6x16x64xf32, #tpu.memory_space<vmem>>, vector<1x6x16x64xf32>
    %29 = vector.shape_cast %28 : vector<1x6x16x64xf32> to vector<6x16x64xf32>
    %30 = tpu.transpose %27, [1, 0] : vector<8x384xf32> -> vector<384x8xf32>
    %31 = vector.shape_cast %30 : vector<384x8xf32> to vector<6x64x8xf32>
    "tpu.trace_start"() <{level = 10 : i32, message = "hld,hdn->hln"}> : () -> ()
    %cst_17 = arith.constant dense<0.000000e+00> : vector<6x16x8xf32>
    %32 = tpu.matmul %29, %31, %cst_17 {dimension_numbers = #tpu.dot_dimension_numbers<[2], [1], [1], [2], [0, 0, 0, 1, 1, 2], [0], [0]>} : vector<6x16x64xf32>, vector<6x64x8xf32>, vector<6x16x8xf32> -> vector<6x16x8xf32>
    "tpu.trace_stop"() : () -> ()
    %cst_18 = arith.constant dense<0xFF800000> : vector<6x16xf32>
    %33 = vector.multi_reduction <maximumf>, %32, %cst_18 [2] : vector<6x16x8xf32> to vector<6x16xf32>
    %34 = vector.shape_cast %33 : vector<6x16xf32> to vector<6x16x1xf32>
    %35 = vector.broadcast %34 : vector<6x16x1xf32> to vector<6x16x8xf32>
    %36 = arith.subf %32, %35 : vector<6x16x8xf32>
    %37 = math.exp %36 : vector<6x16x8xf32>
    %cst_19 = arith.constant dense<0.000000e+00> : vector<6x16xf32>
    %38 = vector.multi_reduction <add>, %37, %cst_19 [2] : vector<6x16x8xf32> to vector<6x16xf32>
    %39 = vector.shape_cast %38 : vector<6x16xf32> to vector<6x16x1xf32>
    %40 = tpu.reciprocal %39 {approx = true} : vector<6x16x1xf32> -> vector<6x16x1xf32>
    %41 = vector.broadcast %40 : vector<6x16x1xf32> to vector<6x16x8xf32>
    %42 = arith.mulf %37, %41 : vector<6x16x8xf32>
    "tpu.trace_start"() <{level = 10 : i32, message = "hln,hdn->hld"}> : () -> ()
    %cst_20 = arith.constant dense<0.000000e+00> : vector<6x16x64xf32>
    %43 = tpu.matmul %42, %31, %cst_20 {dimension_numbers = #tpu.dot_dimension_numbers<[2], [2], [1], [1], [0, 0, 0, 1, 1, 1], [0], [0]>} : vector<6x16x8xf32>, vector<6x64x8xf32>, vector<6x16x64xf32> -> vector<6x16x64xf32>
    "tpu.trace_stop"() : () -> ()
    %44 = vector.extract_strided_slice %43 {offsets = [0, 0, 0], sizes = [1, 16, 64], strides = [1, 1, 1]} : vector<6x16x64xf32> to vector<1x16x64xf32>
    %45 = vector.shape_cast %44 : vector<1x16x64xf32> to vector<16x64xf32>
    %46 = vector.extract_strided_slice %43 {offsets = [1, 0, 0], sizes = [1, 16, 64], strides = [1, 1, 1]} : vector<6x16x64xf32> to vector<1x16x64xf32>
    %47 = vector.shape_cast %46 : vector<1x16x64xf32> to vector<16x64xf32>
    %48 = vector.extract_strided_slice %43 {offsets = [2, 0, 0], sizes = [1, 16, 64], strides = [1, 1, 1]} : vector<6x16x64xf32> to vector<1x16x64xf32>
    %49 = vector.shape_cast %48 : vector<1x16x64xf32> to vector<16x64xf32>
    %50 = vector.extract_strided_slice %43 {offsets = [3, 0, 0], sizes = [1, 16, 64], strides = [1, 1, 1]} : vector<6x16x64xf32> to vector<1x16x64xf32>
    %51 = vector.shape_cast %50 : vector<1x16x64xf32> to vector<16x64xf32>
    %52 = vector.extract_strided_slice %43 {offsets = [4, 0, 0], sizes = [1, 16, 64], strides = [1, 1, 1]} : vector<6x16x64xf32> to vector<1x16x64xf32>
    %53 = vector.shape_cast %52 : vector<1x16x64xf32> to vector<16x64xf32>
    %54 = vector.extract_strided_slice %43 {offsets = [5, 0, 0], sizes = [1, 16, 64], strides = [1, 1, 1]} : vector<6x16x64xf32> to vector<1x16x64xf32>
    %55 = vector.shape_cast %54 : vector<1x16x64xf32> to vector<16x64xf32>
    %56 = tpu.concatenate %45, %47, %49, %51, %53, %55 in 1 : vector<16x64xf32>, vector<16x64xf32>, vector<16x64xf32>, vector<16x64xf32>, vector<16x64xf32>, vector<16x64xf32> -> vector<16x384xf32>
    %c0_21 = arith.constant 0 : index
    %c0_22 = arith.constant 0 : index
    %c0_23 = arith.constant 0 : index
    %57 = vector.load %arg6[%c0_21, %c0_22, %c0_23] : memref<1x384x384xf32, #tpu.memory_space<vmem>>, vector<1x384x384xf32>
    %58 = vector.shape_cast %57 : vector<1x384x384xf32> to vector<384x384xf32>
    %cst_24 = arith.constant dense<0.000000e+00> : vector<16x384xf32>
    %59 = tpu.matmul %56, %58, %cst_24 {dimension_numbers = #tpu.dot_dimension_numbers<[1], [0], [0], [1], [0, 0, 1, 1], [], []>} : vector<16x384xf32>, vector<384x384xf32>, vector<16x384xf32> -> vector<16x384xf32>
    %c0_25 = arith.constant 0 : index
    %c0_26 = arith.constant 0 : index
    %60 = vector.load %arg7[%c0_25, %c0_26] : memref<64x16xf32, #tpu.memory_space<vmem>>, vector<64x16xf32>
    %cst_27 = arith.constant dense<0.000000e+00> : vector<64x384xf32>
    %61 = tpu.matmul %60, %59, %cst_27 {dimension_numbers = #tpu.dot_dimension_numbers<[1], [0], [0], [1], [0, 0, 1, 1], [], []>} : vector<64x16xf32>, vector<16x384xf32>, vector<64x384xf32> -> vector<64x384xf32>
    %c0_28 = arith.constant 0 : index
    %c0_29 = arith.constant 0 : index
    %62 = vector.load %arg8[%c0_28, %c0_29] : memref<1x384xf32, #tpu.memory_space<vmem>>, vector<1x384xf32>
    %c0_30 = arith.constant 0 : index
    %c0_31 = arith.constant 0 : index
    %63 = vector.load %arg9[%c0_30, %c0_31] : memref<1x384xf32, #tpu.memory_space<vmem>>, vector<1x384xf32>
    %cst_32 = arith.constant dense<0.000000e+00> : vector<64xf32>
    %64 = vector.multi_reduction <add>, %61, %cst_32 [1] : vector<64x384xf32> to vector<64xf32>
    %65 = vector.shape_cast %64 : vector<64xf32> to vector<64x1xf32>
    %cst_33 = arith.constant 3.840000e+02 : f32
    %66 = vector.broadcast %cst_33 : f32 to vector<64x1xf32>
    %67 = arith.divf %65, %66 : vector<64x1xf32>
    %68 = vector.broadcast %67 : vector<64x1xf32> to vector<64x384xf32>
    %69 = arith.subf %61, %68 : vector<64x384xf32>
    %70 = arith.mulf %69, %69 : vector<64x384xf32>
    %cst_34 = arith.constant dense<0.000000e+00> : vector<64xf32>
    %71 = vector.multi_reduction <add>, %70, %cst_34 [1] : vector<64x384xf32> to vector<64xf32>
    %72 = vector.shape_cast %71 : vector<64xf32> to vector<64x1xf32>
    %cst_35 = arith.constant 3.840000e+02 : f32
    %73 = vector.broadcast %cst_35 : f32 to vector<64x1xf32>
    %74 = arith.divf %72, %73 : vector<64x1xf32>
    %75 = vector.broadcast %67 : vector<64x1xf32> to vector<64x384xf32>
    %76 = arith.subf %61, %75 : vector<64x384xf32>
    %cst_36 = arith.constant 9.99999974E-6 : f32
    %77 = vector.broadcast %cst_36 : f32 to vector<64x1xf32>
    %78 = arith.addf %74, %77 : vector<64x1xf32>
    %79 = math.rsqrt %78 : vector<64x1xf32>
    %80 = vector.broadcast %79 : vector<64x1xf32> to vector<64x384xf32>
    %81 = arith.mulf %76, %80 : vector<64x384xf32>
    %82 = vector.broadcast %62 : vector<1x384xf32> to vector<64x384xf32>
    %83 = arith.mulf %81, %82 : vector<64x384xf32>
    %84 = vector.broadcast %63 : vector<1x384xf32> to vector<64x384xf32>
    %85 = arith.addf %83, %84 : vector<64x384xf32>
    %86 = vector.shape_cast %85 : vector<64x384xf32> to vector<4x16x384xf32>
    %c0_37 = arith.constant 0 : index
    %c0_38 = arith.constant 0 : index
    %87 = vector.load %arg10[%c0_37, %c0_38] : memref<1x384xf32, #tpu.memory_space<vmem>>, vector<1x384xf32>
    %88 = vector.shape_cast %87 : vector<1x384xf32> to vector<1x1x384xf32>
    %89 = vector.broadcast %88 : vector<1x1x384xf32> to vector<4x16x384xf32>
    %90 = arith.mulf %86, %89 : vector<4x16x384xf32>
    %cst_39 = arith.constant dense<0.000000e+00> : vector<4x16xf32>
    %91 = vector.multi_reduction <add>, %90, %cst_39 [2] : vector<4x16x384xf32> to vector<4x16xf32>
    %92 = tpu.transpose %91, [1, 0] : vector<4x16xf32> -> vector<16x4xf32>
    %cst_40 = arith.constant dense<0xFF800000> : vector<16xf32>
    %93 = vector.multi_reduction <maximumf>, %92, %cst_40 [1] : vector<16x4xf32> to vector<16xf32>
    %94 = vector.shape_cast %93 : vector<16xf32> to vector<16x1xf32>
    %95 = vector.broadcast %94 : vector<16x1xf32> to vector<16x4xf32>
    %96 = arith.subf %92, %95 : vector<16x4xf32>
    %97 = math.exp %96 : vector<16x4xf32>
    %cst_41 = arith.constant dense<0.000000e+00> : vector<16xf32>
    %98 = vector.multi_reduction <add>, %97, %cst_41 [1] : vector<16x4xf32> to vector<16xf32>
    %99 = vector.shape_cast %98 : vector<16xf32> to vector<16x1xf32>
    %100 = tpu.reciprocal %99 {approx = true} : vector<16x1xf32> -> vector<16x1xf32>
    %101 = vector.broadcast %100 : vector<16x1xf32> to vector<16x4xf32>
    %102 = arith.mulf %97, %101 : vector<16x4xf32>
    %103 = vector.extract_strided_slice %86 {offsets = [0, 0, 0], sizes = [1, 16, 384], strides = [1, 1, 1]} : vector<4x16x384xf32> to vector<1x16x384xf32>
    %104 = vector.shape_cast %103 : vector<1x16x384xf32> to vector<16x384xf32>
    %105 = vector.extract_strided_slice %102 {offsets = [0, 0], sizes = [16, 1], strides = [1, 1]} : vector<16x4xf32> to vector<16x1xf32>
    %106 = vector.broadcast %105 : vector<16x1xf32> to vector<16x384xf32>
    %107 = arith.mulf %104, %106 : vector<16x384xf32>
    %108 = vector.extract_strided_slice %86 {offsets = [1, 0, 0], sizes = [1, 16, 384], strides = [1, 1, 1]} : vector<4x16x384xf32> to vector<1x16x384xf32>
    %109 = vector.shape_cast %108 : vector<1x16x384xf32> to vector<16x384xf32>
    %110 = vector.extract_strided_slice %102 {offsets = [0, 1], sizes = [16, 1], strides = [1, 1]} : vector<16x4xf32> to vector<16x1xf32>
    %111 = vector.broadcast %110 : vector<16x1xf32> to vector<16x384xf32>
    %112 = arith.mulf %109, %111 : vector<16x384xf32>
    %113 = arith.addf %107, %112 : vector<16x384xf32>
    %114 = vector.extract_strided_slice %86 {offsets = [2, 0, 0], sizes = [1, 16, 384], strides = [1, 1, 1]} : vector<4x16x384xf32> to vector<1x16x384xf32>
    %115 = vector.shape_cast %114 : vector<1x16x384xf32> to vector<16x384xf32>
    %116 = vector.extract_strided_slice %102 {offsets = [0, 2], sizes = [16, 1], strides = [1, 1]} : vector<16x4xf32> to vector<16x1xf32>
    %117 = vector.broadcast %116 : vector<16x1xf32> to vector<16x384xf32>
    %118 = arith.mulf %115, %117 : vector<16x384xf32>
    %119 = arith.addf %113, %118 : vector<16x384xf32>
    %120 = vector.extract_strided_slice %86 {offsets = [3, 0, 0], sizes = [1, 16, 384], strides = [1, 1, 1]} : vector<4x16x384xf32> to vector<1x16x384xf32>
    %121 = vector.shape_cast %120 : vector<1x16x384xf32> to vector<16x384xf32>
    %122 = vector.extract_strided_slice %102 {offsets = [0, 3], sizes = [16, 1], strides = [1, 1]} : vector<16x4xf32> to vector<16x1xf32>
    %123 = vector.broadcast %122 : vector<16x1xf32> to vector<16x384xf32>
    %124 = arith.mulf %121, %123 : vector<16x384xf32>
    %125 = arith.addf %119, %124 : vector<16x384xf32>
    %cst_42 = arith.constant 0.0510310382 : f32
    %126 = vector.broadcast %cst_42 : f32 to vector<16x384xf32>
    %127 = arith.mulf %125, %126 : vector<16x384xf32>
    %c0_43 = arith.constant 0 : index
    %c0_44 = arith.constant 0 : index
    %c0_45 = arith.constant 0 : index
    %128 = vector.load %arg11[%c0_43, %c0_44, %c0_45] : memref<1x16x384xf32, #tpu.memory_space<vmem>>, vector<1x16x384xf32>
    %129 = vector.shape_cast %128 : vector<1x16x384xf32> to vector<16x384xf32>
    %130 = vector.shape_cast %127 : vector<16x384xf32> to vector<1x16x384xf32>
    tpu.vector_store %arg11[%c0_43, %c0_44, %c0_45], %130 {strides = array<i32>} : memref<1x16x384xf32, #tpu.memory_space<vmem>>, vector<1x16x384xf32>,
    return
  }
  func.func @transform_0(%arg0: i32) -> (i32, i32, i32) {
    %c0_i32 = arith.constant 0 : i32
    %c0_i32_0 = arith.constant 0 : i32
    %c0_i32_1 = arith.constant 0 : i32
    return %arg0, %c0_i32, %c0_i32_0 : i32, i32, i32
  }
  func.func @transform_1(%arg0: i32) -> (i32, i32) {
    %c0_i32 = arith.constant 0 : i32
    %c0_i32_0 = arith.constant 0 : i32
    %c0_i32_1 = arith.constant 0 : i32
    return %c0_i32, %c0_i32_0 : i32, i32
  }
  func.func @transform_2(%arg0: i32) -> (i32, i32) {
    %c0_i32 = arith.constant 0 : i32
    %c0_i32_0 = arith.constant 0 : i32
    %c0_i32_1 = arith.constant 0 : i32
    return %c0_i32, %c0_i32_0 : i32, i32
  }
  func.func @transform_3(%arg0: i32) -> (i32, i32) {
    %c0_i32 = arith.constant 0 : i32
    %c0_i32_0 = arith.constant 0 : i32
    %c0_i32_1 = arith.constant 0 : i32
    return %c0_i32, %c0_i32_0 : i32, i32
  }
  func.func @transform_4(%arg0: i32) -> (i32, i32, i32, i32) {
    %c0_i32 = arith.constant 0 : i32
    %c0_i32_0 = arith.constant 0 : i32
    %c0_i32_1 = arith.constant 0 : i32
    %c0_i32_2 = arith.constant 0 : i32
    %c0_i32_3 = arith.constant 0 : i32
    return %c0_i32, %c0_i32_0, %c0_i32_1, %c0_i32_2 : i32, i32, i32, i32
  }
  func.func @transform_5(%arg0: i32) -> (i32, i32, i32) {
    %c0_i32 = arith.constant 0 : i32
    %c0_i32_0 = arith.constant 0 : i32
    %c0_i32_1 = arith.constant 0 : i32
    %c0_i32_2 = arith.constant 0 : i32
    return %c0_i32, %c0_i32_0, %c0_i32_1 : i32, i32, i32
  }
  func.func @transform_6(%arg0: i32) -> (i32, i32) {
    %c0_i32 = arith.constant 0 : i32
    %c0_i32_0 = arith.constant 0 : i32
    %c0_i32_1 = arith.constant 0 : i32
    return %c0_i32, %c0_i32_0 : i32, i32
  }
  func.func @transform_7(%arg0: i32) -> (i32, i32) {
    %c0_i32 = arith.constant 0 : i32
    %c0_i32_0 = arith.constant 0 : i32
    %c0_i32_1 = arith.constant 0 : i32
    return %c0_i32, %c0_i32_0 : i32, i32
  }
  func.func @transform_8(%arg0: i32) -> (i32, i32) {
    %c0_i32 = arith.constant 0 : i32
    %c0_i32_0 = arith.constant 0 : i32
    %c0_i32_1 = arith.constant 0 : i32
    return %c0_i32, %c0_i32_0 : i32, i32
  }
  func.func @transform_9(%arg0: i32) -> (i32, i32) {
    %c0_i32 = arith.constant 0 : i32
    %c0_i32_0 = arith.constant 0 : i32
    %c0_i32_1 = arith.constant 0 : i32
    return %c0_i32, %c0_i32_0 : i32, i32
  }
  func.func @transform_10(%arg0: i32) -> (i32, i32, i32) {
    %c0_i32 = arith.constant 0 : i32
    %c0_i32_0 = arith.constant 0 : i32
    %c0_i32_1 = arith.constant 0 : i32
    return %arg0, %c0_i32, %c0_i32_0 : i32, i32, i32
  }
}

</mosaic_0001>

<bundles_post_ra>
// kernel: subj_basis_generator_forward.1
= control target key start
LH: loop header
LB: loop body
LE: loop exit
PB: predicated region body
PF: predicated region fallthrough
CT: control target
= control target key end

     0   :  { %15 = vsyncpa [#allocation3], 0  ;;  %s6072_s0 = inlined_call_operand.vmem [shape: f32[2,8,256], index: 0, kind: input, shape index: {}]   ;;  %s6073_s1 = inlined_call_operand.vmem [shape: f32[256,384], index: 1, kind: input, shape index: {}]   ;;  %s6074_s2 = inlined_call_operand.vmem [shape: f32[1,384], index: 2, kind: input, shape index: {}]   ;;  %s6075_s3 = inlined_call_operand.vmem [shape: f32[1,384], index: 3, kind: input, shape index: {}]   ;;  %s6076_s4 = inlined_call_operand.vmem [shape: f32[1,6,16,64], index: 4, kind: input, shape index: {}]   ;;  %s6077_s5 = inlined_call_operand.vmem [shape: f32[1,384,384], index: 5, kind: input, shape index: {}]   ;;  %s6078_s6 = inlined_call_operand.vmem [shape: f32[64,16], index: 6, kind: input, shape index: {}]   ;;  %s6079_s7 = inlined_call_operand.vmem [shape: f32[1,384], index: 7, kind: input, shape index: {}]   ;;  %s6080_s8 = inlined_call_operand.vmem [shape: f32[1,384], index: 8, kind: input, shape index: {}]   ;;  %s6081_s9 = inlined_call_operand.vmem [shape: f32[1,384], index: 9, kind: input, shape index: {}]   ;;  %s6082_s10 = inlined_call_operand.hbm [shape: f32[2,16,384], index: 10, kind: output, shape index: {}]  }
   0x1   :  { %17 = vsyncpa [#allocation3 + $0x1], 0  ;;  %s4212_s13 = smov 0   ;;  %s4214_s14 = smov 0  }
   0x2   :  { %s4216_s15 = smov 0   ;;  %s4218_s16 = smov 0  }
   0x3 LB: > { %s4233_s17 = sadd.s32 4294967295, %s4146_s16   ;;  %s3343_s18 = sadd.s32 4294967294, %s4146_s16   ;;  %s4146_s16 = sphi %s4218_s16, %s6092_s16   ;;  %s4142_s15 = sphi %s4216_s15, %s6091_s15   ;;  %s4138_s14 = sphi %s4214_s14, %s6090_s14   ;;  %s4134_s13 = sphi %s4212_s13, %s6089_s13  }
   0x4   : > { %s4237_s19 = sadd.s32 1, %s4146_s16   ;;  %s245_s20 = sadd.s32 1, %s4142_s15 }
   0x5   : > { %s242_s21 = ssub.s32 %s4146_s16, %s4237_s19  ;;  %p255_p0 = scmp.ne.s32.totalorder %s4142_s15, %s4138_s14 }
   0x6   : > { %p243_p1 = scmp.eq.s32.totalorder %s242_s21, 0  ;;  %p256_p2 = scmp.eq.s32.totalorder %s4233_s17, 1 }
   0x7   : > { %p261_p3 = scmp.ne.s32.totalorder %s4138_s14, %s4134_s13  ;;  %p262_p4 = scmp.eq.s32.totalorder %s3343_s18, 1 }
   0x8   : > { %s4248_s22 = scalar_select %p243_p1, %s4142_s15, %s245_s20  }
   0x9   : > { %p4250_p5 = por %p256_p2, %p255_p0  ;;  %p4254_p6 = por %p262_p4, %p261_p3 }
   0xa   : > { %6084 = sst [smem:[#allocation5_spill]] %s4248_s22  ;;  %p3346_p7 = scmp.ge.s32.totalorder %s4146_s16, 1 }
   0xb   : > { %p315_p8 = scmp.lt.s32.totalorder %s4146_s16, 3 }
   0xd   : > { %p316_p9 = pnand %p3346_p7, %p315_p8 }
   0xe   : > { %p353_p10 = scmp.lt.s32.totalorder (!%p316_p9), %s4233_s17, 1  ;;  %s350_s26 = sand.u32 (!%p316_p9), 1, %s4138_s14  }
   0xf   : > { %319 = sbr.rel (%p316_p9) target bundleno = 3237 (0xca5), region = 60  ;;  %s4154_s21 = smov (!%p316_p9), [#allocation2]  }
  0x10   : > { %s3945_s22 = smul.u32 (!%p316_p9), 48, %s350_s26  ;;  %s4090_s25 = sshll.u32 (!%p316_p9), %s4154_s21, 4  ;;  %s4091_s25 = int_to_ptr.vmem [resolvable:$false] %s4090_s25 }
  0x11   : > { %s3946_s30 = smul.u32 (!%p316_p9), 768, %s4233_s17 }
  0x12   : > { %s6001_s28 = scalar_lea.vmem (!%p316_p9), [#allocation2], %s3945_s22 }
  0x13   : > { %s3281_s11 = sshll.u32 (!%p316_p9), %s6001_s28, 4  ;;  %s6023_s18 = scalar_lea.hbm (!%p316_p9), %s6082_s10, %s3946_s30  ;;  %s6025_s11 = int_to_ptr.vmem [resolvable:$true] %s3281_s11 }
  0x14   : > { %v406_v0 = vld [vmem:[%s6073_s1 + $0x170] sm:$0xff]  ;;  %v405_v1 = vld [vmem:[%s6073_s1 + $0x168] sm:$0xff]  ;;  %v403_v2 = vld [vmem:[%s6073_s1 + $0x158] sm:$0xff]  ;;  %s4432_s27 = scalar_select %p353_p10, %s4233_s17, 1  ;;  %vm767_vm0 = vcmask 523264   ;;  %vm1254_vm1 = vcmask 64512  }
  0x15   : > { %456 = vmatprep.subr.mxu0 %v406_v0  ;;  %v402_v3 = vld [vmem:[%s6073_s1 + $0x150] sm:$0xff]  ;;  %v400_v4 = vld [vmem:[%s6073_s1 + $0x140] sm:$0xff]  ;;  %v399_v5 = vld [vmem:[%s6073_s1 + $0x138] sm:$0xff]  ;;  %vm2503_vm2 = vcmask 130048   ;;  %vm3088_vm3 = vcmask 130112   ;;  %vm3117_vm4 = vcmask 1041409   ;;  %p4093_p0 = scmp.lt.s32.totalorder %s6025_s11, %s4091_s25 }
  0x16   : > { %457 = vmatpush1.msra.mxu0 %v405_v1  ;;  %v397_v6 = vld [vmem:[%s6073_s1 + $0x128] sm:$0xff]  ;;  %v396_v7 = vld [vmem:[%s6073_s1 + $0x120] sm:$0xff]  ;;  %v394_v8 = vld [vmem:[%s6073_s1 + $0x110] sm:$0xff]  ;;  %s3440_s20 = sshll.u32 %s4432_s27, 4  ;;  %vm3119_vm5 = vcmask 1042434   ;;  %vm3121_vm6 = vcmask 1043459  }
  0x17   : > { %458 = vmatprep.subr.mxu0 %v403_v2  ;;  %v393_v9 = vld [vmem:[%s6073_s1 + $0x108] sm:$0xff]  ;;  %v391_v10 = vld [vmem:[%s6073_s1 + $0xf8] sm:$0xff]  ;;  %v390_v11 = vld [vmem:[%s6073_s1 + $0xf0] sm:$0xff]  ;;  %s357_s29 = scalar_lea.vmem %s6072_s0, %s3440_s20  ;;  %vm3156_vm7 = vcmask 31744   ;;  %s6032_s17 = scalar_lea.sflag [#allocation3], %s350_s26 }
  0x18   : > { %459 = vmatpush1.msra.mxu0 %v402_v3  ;;  %v388_v12 = vld [vmem:[%s6073_s1 + $0xe0] sm:$0xff]  ;;  %v455_v13 = vld [vmem:[%s6073_s1 + $0x2f8] sm:$0xff]  ;;  %v385_v17 = vld [vmem:[%s6073_s1 + $0xc8] sm:$0xff]  ;;  %s4092_s20 = scalar_lea.vmem %s4091_s25, 1536 }
  0x19   : > { %460 = vmatprep.subr.mxu0 %v400_v4  ;;  %v387_v14 = vld [vmem:[%s6073_s1 + $0xd8] sm:$0xff]  ;;  %3441 = vmatprep.subr.mxu1 %v455_v13  ;;  %v452_v16 = vld [vmem:[%s6073_s1 + $0x2e0] sm:$0xff]  ;;  %v449_v20 = vld [vmem:[%s6073_s1 + $0x2c8] sm:$0xff] }
  0x1a   : > { %461 = vmatpush1.msra.mxu0 %v399_v5  ;;  %v407_v15 = vld [vmem:[%s6073_s1 + $0x178] sm:$0xff]  ;;  %v404_v18 = vld [vmem:[%s6073_s1 + $0x160] sm:$0xff]  ;;  %v401_v21 = vld [vmem:[%s6073_s1 + $0x148] sm:$0xff] }
  0x1b   : > { %462 = vmatprep.subr.mxu0 %v397_v6  ;;  %3442 = vmatpush3.msra.mxu1 %v407_v15  ;;  %v384_v19 = vld [vmem:[%s6073_s1 + $0xc0] sm:$0xff]  ;;  %v382_v22 = vld [vmem:[%s6073_s1 + $0xb0] sm:$0xff]  ;;  %v381_v24 = vld [vmem:[%s6073_s1 + $0xa8] sm:$0xff] }
  0x1c   : > { %463 = vmatpush1.msra.mxu0 %v396_v7  ;;  %3443 = vmatprep.subr.mxu1 %v452_v16  ;;  %v446_v23 = vld [vmem:[%s6073_s1 + $0x2b0] sm:$0xff]  ;;  %v379_v26 = vld [vmem:[%s6073_s1 + $0x98] sm:$0xff]  ;;  %v376_v30 = vld [vmem:[%s6073_s1 + $0x80] sm:$0xff] }
  0x1d   : > { %464 = vmatprep.subr.mxu0 %v394_v8  ;;  %3444 = vmatpush3.msra.mxu1 %v404_v18  ;;  %v398_v25 = vld [vmem:[%s6073_s1 + $0x130] sm:$0xff]  ;;  %v443_v27 = vld [vmem:[%s6073_s1 + $0x298] sm:$0xff]  ;;  %v440_v31 = vld [vmem:[%s6073_s1 + $0x280] sm:$0xff] }
  0x1e   : > { %465 = vmatpush1.msra.mxu0 %v393_v9  ;;  %3445 = vmatprep.subr.mxu1 %v449_v20  ;;  %v378_v28 = vld [vmem:[%s6073_s1 + $0x90] sm:$0xff]  ;;  %v395_v29 = vld [vmem:[%s6073_s1 + $0x118] sm:$0xff]  ;;  %v392_v33 = vld [vmem:[%s6073_s1 + $0x100] sm:$0xff] }
  0x1f   : > { %466 = vmatprep.subr.mxu0 %v391_v10  ;;  %3446 = vmatpush3.msra.mxu1 %v401_v21  ;;  %v375_v32 = vld [vmem:[%s6073_s1 + $0x78] sm:$0xff]  ;;  %v373_v34 = vld [vmem:[%s6073_s1 + $0x68] sm:$0xff]  ;;  %v372_v36 = vld [vmem:[%s6073_s1 + $0x60] sm:$0xff] }
  0x20   : > { %467 = vmatpush1.msra.mxu0 %v390_v11  ;;  %3447 = vmatprep.subr.mxu1 %v446_v23  ;;  %v437_v35 = vld [vmem:[%s6073_s1 + $0x268] sm:$0xff]  ;;  %v370_v38 = vld [vmem:[%s6073_s1 + $0x50] sm:$0xff]  ;;  %v367_v42 = vld [vmem:[%s6073_s1 + $0x38] sm:$0xff] }
  0x21   : > { %468 = vmatprep.subr.mxu0 %v388_v12  ;;  %3448 = vmatpush3.msra.mxu1 %v398_v25  ;;  %v389_v37 = vld [vmem:[%s6073_s1 + $0xe8] sm:$0xff]  ;;  %v434_v39 = vld [vmem:[%s6073_s1 + $0x250] sm:$0xff]  ;;  %v431_v43 = vld [vmem:[%s6073_s1 + $0x238] sm:$0xff] }
  0x22   : > { %469 = vmatpush1.msra.mxu0 %v387_v14  ;;  %3449 = vmatprep.subr.mxu1 %v443_v27  ;;  %v369_v40 = vld [vmem:[%s6073_s1 + $0x48] sm:$0xff]  ;;  %v386_v41 = vld [vmem:[%s6073_s1 + $0xd0] sm:$0xff]  ;;  %v383_v45 = vld [vmem:[%s6073_s1 + $0xb8] sm:$0xff] }
  0x23   : > { %470 = vmatprep.subr.mxu0 %v385_v17  ;;  %3450 = vmatpush3.msra.mxu1 %v395_v29  ;;  %v366_v44 = vld [vmem:[%s6073_s1 + $0x30] sm:$0xff]  ;;  %v364_v46 = vld [vmem:[%s6073_s1 + $0x20] sm:$0xff]  ;;  %v363_v48 = vld [vmem:[%s6073_s1 + $0x18] sm:$0xff] }
  0x24   : > { %471 = vmatpush1.msra.mxu0 %v384_v19  ;;  %3451 = vmatprep.subr.mxu1 %v440_v31  ;;  %v428_v47 = vld [vmem:[%s6073_s1 + $0x220] sm:$0xff]  ;;  %v361_v50 = vld [vmem:[%s6073_s1 + $0x8] sm:$0xff]  ;;  %v454_v54 = vld [vmem:[%s6073_s1 + $0x2f0] sm:$0xff] }
  0x25   : > { %472 = vmatprep.subr.mxu0 %v382_v22  ;;  %3452 = vmatpush3.msra.mxu1 %v392_v33  ;;  %v380_v49 = vld [vmem:[%s6073_s1 + $0xa0] sm:$0xff]  ;;  %v425_v51 = vld [vmem:[%s6073_s1 + $0x208] sm:$0xff]  ;;  %v422_v55 = vld [vmem:[%s6073_s1 + $0x1f0] sm:$0xff] }
  0x26   : > { %473 = vmatpush1.msra.mxu0 %v381_v24  ;;  %3453 = vmatprep.subr.mxu1 %v437_v35  ;;  %v360_v52 = vld [vmem:[%s6073_s1] sm:$0xff]  ;;  %v377_v53 = vld [vmem:[%s6073_s1 + $0x88] sm:$0xff]  ;;  %v374_v57 = vld [vmem:[%s6073_s1 + $0x70] sm:$0xff] }
  0x27   : > { %474 = vmatprep.subr.mxu0 %v379_v26  ;;  %3454 = vmatpush3.msra.mxu1 %v389_v37  ;;  %v453_v56 = vld [vmem:[%s6073_s1 + $0x2e8] sm:$0xff]  ;;  %v451_v58 = vld [vmem:[%s6073_s1 + $0x2d8] sm:$0xff]  ;;  %v450_v60 = vld [vmem:[%s6073_s1 + $0x2d0] sm:$0xff] }
  0x28   : > { %475 = vmatpush1.msra.mxu0 %v378_v28  ;;  %3455 = vmatprep.subr.mxu1 %v434_v39  ;;  %v419_v59 = vld [vmem:[%s6073_s1 + $0x1d8] sm:$0xff]  ;;  %v448_v62 = vld [vmem:[%s6073_s1 + $0x2c0] sm:$0xff]  ;;  %v445_v2 = vld [vmem:[%s6073_s1 + $0x2a8] sm:$0xff] }
  0x29   : > { %476 = vmatprep.subr.mxu0 %v376_v30  ;;  %3456 = vmatpush3.msra.mxu1 %v386_v41  ;;  %v371_v61 = vld [vmem:[%s6073_s1 + $0x58] sm:$0xff]  ;;  %v416_v63 = vld [vmem:[%s6073_s1 + $0x1c0] sm:$0xff]  ;;  %v413_v3 = vld [vmem:[%s6073_s1 + $0x1a8] sm:$0xff] }
  0x2a   : > { %477 = vmatpush1.msra.mxu0 %v375_v32  ;;  %3457 = vmatprep.subr.mxu1 %v431_v43  ;;  %v447_v0 = vld [vmem:[%s6073_s1 + $0x2b8] sm:$0xff]  ;;  %v368_v1 = vld [vmem:[%s6073_s1 + $0x40] sm:$0xff]  ;;  %v365_v5 = vld [vmem:[%s6073_s1 + $0x28] sm:$0xff] }
  0x2b   : > { %478 = vmatprep.subr.mxu0 %v373_v34  ;;  %3458 = vmatpush3.msra.mxu1 %v383_v45  ;;  %v444_v4 = vld [vmem:[%s6073_s1 + $0x2a0] sm:$0xff]  ;;  %v442_v6 = vld [vmem:[%s6073_s1 + $0x290] sm:$0xff]  ;;  %v441_v8 = vld [vmem:[%s6073_s1 + $0x288] sm:$0xff] }
  0x2c   : > { %479 = vmatpush1.msra.mxu0 %v372_v36  ;;  %3459 = vmatprep.subr.mxu1 %v428_v47  ;;  %v410_v7 = vld [vmem:[%s6073_s1 + $0x190] sm:$0xff]  ;;  %v439_v10 = vld [vmem:[%s6073_s1 + $0x278] sm:$0xff]  ;;  %v359_v11 = vld [vmem:[%s357_s29 + $0x8] sm:$0xff] }
  0x2d   : > { %480 = vmatprep.subr.mxu0 %v370_v38  ;;  %3460 = vmatpush3.msra.mxu1 %v380_v49  ;;  %v362_v9 = vld [vmem:[%s6073_s1 + $0x10] sm:$0xff]  ;;  %v358_v13 = vld [vmem:[%s357_s29] sm:$0xff]  ;;  %v435_v15 = vld [vmem:[%s6073_s1 + $0x258] sm:$0xff]  ;;  %s4148_s29 = smov 64  }
  0x2e   : > { %481 = vmatpush1.msra.mxu0 %v369_v40  ;;  %3461 = vmatprep.subr.mxu1 %v425_v51  ;;  %v438_v12 = vld [vmem:[%s6073_s1 + $0x270] sm:$0xff]  ;;  %v436_v14 = vld [vmem:[%s6073_s1 + $0x260] sm:$0xff]  ;;  %v433_v16 = vld [vmem:[%s6073_s1 + $0x248] sm:$0xff] }
  0x2f   : > { %482 = vmatprep.subr.mxu0 %v367_v42  ;;  %3462 = vmatpush3.msra.mxu1 %v377_v53  ;;  %v432_v17 = vld [vmem:[%s6073_s1 + $0x240] sm:$0xff]  ;;  %v430_v18 = vld [vmem:[%s6073_s1 + $0x230] sm:$0xff]  ;;  %v429_v19 = vld [vmem:[%s6073_s1 + $0x228] sm:$0xff] }
  0x30   : > { %483 = vmatpush1.msra.mxu0 %v366_v44  ;;  %3463 = vmatprep.subr.mxu1 %v422_v55  ;;  %v427_v20 = vld [vmem:[%s6073_s1 + $0x218] sm:$0xff]  ;;  %v426_v21 = vld [vmem:[%s6073_s1 + $0x210] sm:$0xff]  ;;  %v424_v22 = vld [vmem:[%s6073_s1 + $0x200] sm:$0xff] }
  0x31   : > { %484 = vmatprep.subr.mxu0 %v364_v46  ;;  %3464 = vmatpush3.msra.mxu1 %v374_v57  ;;  %v423_v23 = vld [vmem:[%s6073_s1 + $0x1f8] sm:$0xff]  ;;  %v421_v24 = vld [vmem:[%s6073_s1 + $0x1e8] sm:$0xff]  ;;  %v420_v25 = vld [vmem:[%s6073_s1 + $0x1e0] sm:$0xff] }
  0x32   : > { %485 = vmatpush1.msra.mxu0 %v363_v48  ;;  %3465 = vmatprep.subr.mxu1 %v419_v59  ;;  %v418_v26 = vld [vmem:[%s6073_s1 + $0x1d0] sm:$0xff]  ;;  %v417_v27 = vld [vmem:[%s6073_s1 + $0x1c8] sm:$0xff]  ;;  %v415_v28 = vld [vmem:[%s6073_s1 + $0x1b8] sm:$0xff] }
  0x33   : > { %486 = vmatprep.subr.mxu0 %v361_v50  ;;  %3466 = vmatpush3.msra.mxu1 %v371_v61  ;;  %v414_v29 = vld [vmem:[%s6073_s1 + $0x1b0] sm:$0xff]  ;;  %v412_v30 = vld [vmem:[%s6073_s1 + $0x1a0] sm:$0xff]  ;;  %v411_v31 = vld [vmem:[%s6073_s1 + $0x198] sm:$0xff] }
  0x34   : > { %487 = vmatpush1.msra.mxu0 %v360_v52  ;;  %3467 = vmatprep.subr.mxu1 %v416_v63  ;;  %v409_v32 = vld [vmem:[%s6073_s1 + $0x188] sm:$0xff]  ;;  %v408_v33 = vld [vmem:[%s6073_s1 + $0x180] sm:$0xff] }
  0x35   : > { %488 = vmatprep.subr.mxu0 %v454_v54  ;;  %3468 = vmatpush3.msra.mxu1 %v368_v1  ;;  %v6083_v54 = vlaneseq  ;;  %v598_v59 = vld [vmem:[%s6075_s3] sm:$0x7] }
  0x36   : > { %489 = vmatpush2.msra.mxu0 %v453_v56  ;;  %3469 = vmatprep.subr.mxu1 %v413_v3 }
  0x37   : > { %490 = vmatprep.subr.mxu0 %v451_v58  ;;  %3470 = vmatpush3.msra.mxu1 %v365_v5  ;;  %v4559_v55 = vshrl.u32 %v6083_v54, 7  ;;  %v597_v58 = vld [vmem:[%s6074_s2] sm:$0x7] }
  0x38   : > { %491 = vmatpush2.msra.mxu0 %v450_v60  ;;  %3471 = vmatprep.subr.mxu1 %v410_v7 }
  0x39   : > { %492 = vmatprep.subr.mxu0 %v448_v62  ;;  %3472 = vmatpush3.msra.mxu1 %v362_v9  ;;  %v4562_v56 = vsub.s32 2, %v4559_v55  ;;  %v4565_v57 = vsub.s32 0, %v4559_v55  ;;  %v4578_v7 = vsub.s32 1, %v4559_v55 }
  0x3a   : > { %493 = vmatpush2.msra.mxu0 %v447_v0  ;;  %591 = vmatprep.mubr.f32.mxu1 %v359_v11 }
  0x3b   : > { %494 = vmatprep.subr.mxu0 %v445_v2  ;;  %592 = vmatmul.mubr.f32.vlgmr.msra.gmra.mxu1 %v358_v13  ;;  %v633_v60 = vrot.slane %v597_v58, %v4562_v56  ;;  %v625_v61 = vrot.slane %v597_v58, %v4565_v57  ;;  %v652_v0 = vrot.slane %v598_v59, %v4562_v56 }
  0x3c   : > { %495 = vmatpush2.msra.mxu0 %v444_v4  ;;  %520 = vmatprep.mubr.f32.mxu0 %v359_v11  ;;  %v644_v2 = vrot.slane %v598_v59, %v4565_v57  ;;  %v629_v9 = vrot.slane %v597_v58, %v4578_v7  ;;  %v648_v11 = vrot.slane %v598_v59, %v4578_v7 }
  0x3d   : > { %496 = vmatprep.subr.mxu0 %v442_v6 }
  0x3e   : > { %497 = vmatpush2.msra.mxu0 %v441_v8 }
  0x3f   : > { %498 = vmatprep.subr.mxu0 %v439_v10 }
  0x40   : > { %499 = vmatpush2.msra.mxu0 %v438_v12  ;;  %v659_v12 = vld [vmem:[%s6076_s4] sm:$0xff] }
  0x41   : > { %500 = vmatprep.subr.mxu0 %v436_v14  ;;  %3678 = vmatprep.mubr.msk.f32.mxu1 %vm767_vm0, %v659_v12  ;;  %v663_v14 = vld [vmem:[%s6076_s4 + $0x20] sm:$0xff]  ;;  %v669_v12 = vld [vmem:[%s6076_s4 + $0x50] sm:$0xff] }
  0x42   : > { %501 = vmatpush2.msra.mxu0 %v435_v15 }
  0x43   : > { %502 = vmatprep.subr.mxu0 %v433_v16 }
  0x44   : > { %503 = vmatpush2.msra.mxu0 %v432_v17 }
  0x45   : > { %504 = vmatprep.subr.mxu0 %v430_v18 }
  0x46   : > { %505 = vmatpush2.msra.mxu0 %v429_v19 }
  0x47   : > { %506 = vmatprep.subr.mxu0 %v427_v20 }
  0x48   : > { %507 = vmatpush2.msra.mxu0 %v426_v21 }
  0x49   : > { %508 = vmatprep.subr.mxu0 %v424_v22 }
  0x4a   : > { %509 = vmatpush2.msra.mxu0 %v423_v23 }
  0x4b   : > { %510 = vmatprep.subr.mxu0 %v421_v24 }
  0x4c   : > { %511 = vmatpush2.msra.mxu0 %v420_v25 }
  0x4d   : > { %512 = vmatprep.subr.mxu0 %v418_v26  ;;  %v660_v26 = vld [vmem:[%s6076_s4 + $0x8] sm:$0xff] }
  0x4e   : > { %513 = vmatpush2.msra.mxu0 %v417_v27  ;;  %v661_v27 = vld [vmem:[%s6076_s4 + $0x10] sm:$0xff] }
  0x4f   : > { %514 = vmatprep.subr.mxu0 %v415_v28 }
  0x50   : > { %515 = vmatpush2.msra.mxu0 %v414_v29 }
  0x51   : > { %516 = vmatprep.subr.mxu0 %v412_v30 }
  0x52   : > { %517 = vmatpush2.msra.mxu0 %v411_v31 }
  0x53   : > { %518 = vmatprep.subr.mxu0 %v409_v32 }
  0x54   : > { %519 = vmatpush2.msra.mxu0 %v408_v33 }
  0x55   : > { %521 = vmatmul.mubr.f32.vlgmr.msra.gmra.mxu0 %v358_v13 }
  0x56   : > { %3716 = vmatprep.mubr.msk.f32.mxu0 %vm767_vm0, %v663_v14 }
  0xfb   : > { %v3473_v34 = vpop.f32.mrf.mxu1 }
  0xfd   : > { %v3474_v36 = vpop.f32.mrf.mxu1 }
  0xfe   : > { %v3475_v38 = vadd.f32 %v3474_v36, %v3473_v34 }
 0x115   : > { %v522_v35 = vpop.f32.mrf.mxu0 }
 0x117   : > { %v524_v37 = vpop.f32.mrf.mxu0 }
 0x118   : > { %v599_v39 = vadd.f32 %v524_v37, %v522_v35 }
 0x11a   : > { %v600_v40 = vadd.f32 %v3475_v38, %v599_v39 }
 0x11c   : > { %601 = vadd.xlane.f32.xlu0 %v600_v40 }
 0x1a5   : > { %v602_v41 = vpop.xlane.xlu0 %601 }
 0x1a6   : > { %v604_v42 = vmul.f32 0.0026041667, %v602_v41  ;;  %v662_v41 = vld [vmem:[%s6076_s4 + $0x18] sm:$0xff] }
 0x1a8   : > { %v605_v43 = vsub.f32 %v522_v35, %v604_v42  ;;  %v606_v44 = vsub.f32 %v524_v37, %v604_v42  ;;  %v607_v45 = vsub.f32 %v3475_v38, %v604_v42  ;;  %v665_v42 = vld [vmem:[%s6076_s4 + $0x30] sm:$0xff] }
 0x1aa   : > { %v608_v46 = vmul.f32 %v605_v43, %v605_v43  ;;  %v609_v47 = vmul.f32 %v606_v44, %v606_v44  ;;  %v610_v48 = vmul.f32 %v607_v45, %v607_v45 }
 0x1ac   : > { %v611_v49 = vadd.f32 %v609_v47, %v608_v46 }
 0x1ae   : > { %v612_v50 = vadd.f32 %v611_v49, %v610_v48 }
 0x1b0   : > { %613 = vadd.xlane.f32.xlu0 %v612_v50 }
 0x239   : > { %v614_v51 = vpop.xlane.xlu0 %613 }
 0x23a   : > { %v615_v52 = vmul.f32 0.0026041667, %v614_v51 }
 0x23c   : > { %v616_v53 = vadd.f32 1e-05, %v615_v52 }
 0x23e   : > { %4012 = vrsqrt.f32 %v616_v53 }
 0x24b   : > { %v4013_v62 = vpop.eup %4012 }
 0x24c   : > { %v620_v63 = vmul.f32 %v4013_v62, %v607_v45  ;;  %v618_v1 = vmul.f32 %v4013_v62, %v605_v43  ;;  %v619_v8 = vmul.f32 %v4013_v62, %v606_v44 }
 0x24e   : > { %v639_v3 = vmul.f32 %v633_v60, %v620_v63  ;;  %v637_v4 = vmul.f32 %v625_v61, %v618_v1  ;;  %v638_v10 = vmul.f32 %v629_v9, %v619_v8  ;;  %v664_v60 = vld [vmem:[%s6076_s4 + $0x28] sm:$0xff]  ;;  %v667_v61 = vld [vmem:[%s6076_s4 + $0x40] sm:$0xff] }
 0x250   : > { %v658_v5 = vadd.f32 %v652_v0, %v639_v3  ;;  %v656_v6 = vadd.f32 %v644_v2, %v637_v4  ;;  %v657_v13 = vadd.f32 %v648_v11, %v638_v10  ;;  %v666_v11 = vld [vmem:[%s6076_s4 + $0x38] sm:$0xff] }
 0x252   : > { %735 = vxpose.xlu0.b32.start.end [1/1] (short) %v658_v5, 128  ;;  %671 = vxpose.xlu1.b32.start.end [1/1] (short) %v656_v6, 128  ;;  %v668_v5 = vld [vmem:[%s6076_s4 + $0x48] sm:$0xff] }
 0x28f   : > { %703 = vxpose.xlu1.b32.start.end [1/1] (short) %v657_v13, 128  ;;  %v670_v13 = vld [vmem:[%s6076_s4 + $0x58] sm:$0xff] }
 0x2ce   : > { %v4590_v15 = vpop.trf.xlu1  ;;  %v4640_v30 = vpop.trf.xlu0 }
 0x2d2   : > { %v4592_v16 = vpop.trf.xlu1  ;;  %v4644_v32 = vpop.trf.xlu0 }
 0x2d6   : > { %v4594_v17 = vpop.trf.xlu1  ;;  %v4650_v35 = vpop.trf.xlu0 }
 0x2da   : > { %v4596_v18 = vpop.trf.xlu1  ;;  %v4660_v37 = vpop.trf.xlu0 }
 0x2de   : > { %v4598_v19 = vpop.trf.xlu1  ;;  %v4672_v40 = vpop.trf.xlu0 }
 0x2e2   : > { %v4600_v20 = vpop.trf.xlu1  ;;  %v4687_v44 = vpop.trf.xlu0 }
 0x2e6   : > { %v4602_v21 = vpop.trf.xlu1  ;;  %v4694_v47 = vpop.trf.xlu0 }
 0x2ea   : > { %v4604_v22 = vpop.trf.xlu1  ;;  %v4698_v49 = vpop.trf.xlu0 }
 0x2eb   : > { %3662 = vmatprep.subr.mxu1 %v4604_v22 }
 0x2ec   : > { %3663 = vmatpush3.msra.mxu1 %v4604_v22 }
 0x2ed   : > { %3664 = vmatprep.subr.mxu1 %v4602_v21 }
 0x2ee   : > { %3665 = vmatpush3.msra.mxu1 %v4602_v21  ;;  %v4610_v23 = vpop.trf.xlu1  ;;  %v4708_v52 = vpop.trf.xlu0 }
 0x2ef   : > { %3666 = vmatprep.subr.mxu1 %v4600_v20 }
 0x2f0   : > { %3667 = vmatpush3.msra.mxu1 %v4600_v20 }
 0x2f1   : > { %3668 = vmatprep.subr.mxu1 %v4598_v19 }
 0x2f2   : > { %3669 = vmatpush3.msra.mxu1 %v4598_v19  ;;  %v4616_v24 = vpop.trf.xlu1  ;;  %v4718_v58 = vpop.trf.xlu0 }
 0x2f3   : > { %3670 = vmatprep.subr.mxu1 %v4596_v18 }
 0x2f4   : > { %3671 = vmatpush3.msra.mxu1 %v4596_v18 }
 0x2f5   : > { %3672 = vmatprep.subr.mxu1 %v4594_v17 }
 0x2f6   : > { %3673 = vmatpush3.msra.mxu1 %v4594_v17  ;;  %v4622_v25 = vpop.trf.xlu1  ;;  %v4736_v63 = vpop.trf.xlu0 }
 0x2f7   : > { %3674 = vmatprep.subr.mxu1 %v4592_v16 }
 0x2f8   : > { %3675 = vmatpush3.msra.mxu1 %v4592_v16 }
 0x2f9   : > { %3676 = vmatprep.subr.mxu1 %v4590_v15 }
 0x2fa   : > { %3677 = vmatpush3.msra.mxu1 %v4590_v15  ;;  %v4634_v28 = vpop.trf.xlu1  ;;  %v4748_v1 = vpop.trf.xlu0 }
 0x2fb   : > { %3679 = vmatmul.mubr.msk.f32.vlgmr.msra.gmra.mxu1 %vm767_vm0, %v660_v26 }
 0x2fc   : > { %3697 = vmatprep.mubr.msk.f32.mxu1 %vm767_vm0, %v661_v27 }
 0x2fe   : > { %v4638_v29 = vpop.trf.xlu1  ;;  %v4760_v4 = vpop.trf.xlu0 }
 0x302   : > { %v4642_v31 = vpop.trf.xlu1  ;;  %v4776_v8 = vpop.trf.xlu0 }
 0x306   : > { %v4646_v33 = vpop.trf.xlu1  ;;  %v4792_v9 = vpop.trf.xlu0 }
 0x30a   : > { %v4648_v34 = vpop.trf.xlu1  ;;  %v4804_v10 = vpop.trf.xlu0 }
 0x30b   : > { %3681 = vmatprep.subr.mxu1 %v4648_v34 }
 0x30c   : > { %3682 = vmatpush3.msra.mxu1 %v4648_v34 }
 0x30d   : > { %3683 = vmatprep.subr.mxu1 %v4646_v33 }
 0x30e   : > { %3684 = vmatpush3.msra.mxu1 %v4646_v33  ;;  %v4656_v36 = vpop.trf.xlu1 }
 0x30f   : > { %3685 = vmatprep.subr.mxu1 %v4642_v31 }
 0x310   : > { %3686 = vmatpush3.msra.mxu1 %v4642_v31 }
 0x311   : > { %3687 = vmatprep.subr.mxu1 %v4638_v29 }
 0x312   : > { %3688 = vmatpush3.msra.mxu1 %v4638_v29  ;;  %v4664_v38 = vpop.trf.xlu1 }
 0x313   : > { %3689 = vmatprep.subr.mxu1 %v4634_v28 }
 0x314   : > { %3690 = vmatpush3.msra.mxu1 %v4634_v28 }
 0x315   : > { %3691 = vmatprep.subr.mxu1 %v4622_v25 }
 0x316   : > { %3692 = vmatpush3.msra.mxu1 %v4622_v25  ;;  %v4670_v39 = vpop.trf.xlu1 }
 0x317   : > { %3693 = vmatprep.subr.mxu1 %v4616_v24 }
 0x318   : > { %3694 = vmatpush3.msra.mxu1 %v4616_v24 }
 0x319   : > { %3695 = vmatprep.subr.mxu1 %v4610_v23 }
 0x31a   : > { %3696 = vmatpush3.msra.mxu1 %v4610_v23  ;;  %v4684_v43 = vpop.trf.xlu1 }
 0x31b   : > { %3698 = vmatmul.mubr.msk.f32.vlgmr.msra.gmra.mxu1 %vm767_vm0, %v662_v41 }
 0x31c   : > { %3735 = vmatprep.mubr.msk.f32.mxu1 %vm767_vm0, %v665_v42 }
 0x31e   : > { %v4690_v45 = vpop.trf.xlu1 }
 0x322   : > { %v4692_v46 = vpop.trf.xlu1 }
 0x326   : > { %v4696_v48 = vpop.trf.xlu1 }
 0x32a   : > { %v4700_v50 = vpop.trf.xlu1 }
 0x32b   : > { %3700 = vmatprep.subr.mxu0 %v4700_v50 }
 0x32c   : > { %3701 = vmatpush3.msra.mxu0 %v4700_v50 }
 0x32d   : > { %3702 = vmatprep.subr.mxu0 %v4696_v48 }
 0x32e   : > { %3703 = vmatpush3.msra.mxu0 %v4696_v48  ;;  %v4706_v51 = vpop.trf.xlu1 }
 0x32f   : > { %3704 = vmatprep.subr.mxu0 %v4692_v46 }
 0x330   : > { %3705 = vmatpush3.msra.mxu0 %v4692_v46 }
 0x331   : > { %3706 = vmatprep.subr.mxu0 %v4690_v45 }
 0x332   : > { %3707 = vmatpush3.msra.mxu0 %v4690_v45  ;;  %v4714_v53 = vpop.trf.xlu1 }
 0x333   : > { %3708 = vmatprep.subr.mxu0 %v4684_v43 }
 0x334   : > { %3709 = vmatpush3.msra.mxu0 %v4684_v43 }
 0x335   : > { %3710 = vmatprep.subr.mxu0 %v4670_v39 }
 0x336   : > { %3711 = vmatpush3.msra.mxu0 %v4670_v39  ;;  %v4722_v59 = vpop.trf.xlu1 }
 0x337   : > { %3712 = vmatprep.subr.mxu0 %v4664_v38 }
 0x338   : > { %3713 = vmatpush3.msra.mxu0 %v4664_v38 }
 0x339   : > { %3714 = vmatprep.subr.mxu0 %v4656_v36 }
 0x33a   : > { %3715 = vmatpush3.msra.mxu0 %v4656_v36  ;;  %v4734_v62 = vpop.trf.xlu1 }
 0x33b   : > { %3738 = vmatprep.subr.mxu0 %v4698_v49  ;;  %3717 = vmatmul.mubr.msk.f32.vlgmr.msra.gmra.mxu0 %vm767_vm0, %v664_v60 }
 0x33c   : > { %3739 = vmatpush3.msra.mxu0 %v4698_v49  ;;  %3754 = vmatprep.mubr.msk.f32.mxu0 %vm767_vm0, %v667_v61 }
 0x33d   : > { %3740 = vmatprep.subr.mxu0 %v4694_v47 }
 0x33e   : > { %3741 = vmatpush3.msra.mxu0 %v4694_v47  ;;  %v4744_v0 = vpop.trf.xlu1 }
 0x33f   : > { %3742 = vmatprep.subr.mxu0 %v4687_v44 }
 0x340   : > { %3743 = vmatpush3.msra.mxu0 %v4687_v44 }
 0x341   : > { %3744 = vmatprep.subr.mxu0 %v4672_v40 }
 0x342   : > { %3745 = vmatpush3.msra.mxu0 %v4672_v40  ;;  %v4752_v2 = vpop.trf.xlu1 }
 0x343   : > { %3746 = vmatprep.subr.mxu0 %v4660_v37 }
 0x344   : > { %3747 = vmatpush3.msra.mxu0 %v4660_v37 }
 0x345   : > { %3748 = vmatprep.subr.mxu0 %v4650_v35 }
 0x346   : > { %3749 = vmatpush3.msra.mxu0 %v4650_v35  ;;  %v4758_v3 = vpop.trf.xlu1 }
 0x347   : > { %3750 = vmatprep.subr.mxu0 %v4644_v32 }
 0x348   : > { %3751 = vmatpush3.msra.mxu0 %v4644_v32 }
 0x349   : > { %3752 = vmatprep.subr.mxu0 %v4640_v30 }
 0x34a   : > { %3753 = vmatpush3.msra.mxu0 %v4640_v30  ;;  %v4769_v6 = vpop.trf.xlu1 }
 0x34b   : > { %3719 = vmatprep.subr.mxu1 %v4769_v6  ;;  %3776 = vmatprep.subr.msk.mxu0 %vm1254_vm1, %v4604_v22 }
 0x34c   : > { %3720 = vmatpush3.msra.mxu1 %v4769_v6  ;;  %3755 = vmatmul.mubr.msk.f32.vlgmr.msra.gmra.mxu0 %vm767_vm0, %v668_v5 }
 0x34d   : > { %3777 = vmatpush3.xpose.msk.msra.mxu0 %vm1254_vm1, %v4604_v22  ;;  %3721 = vmatprep.subr.mxu1 %v4758_v3 }
 0x34e   : > { %3778 = vmatprep.subr.msk.mxu0 %vm1254_vm1, %v4602_v21  ;;  %3722 = vmatpush3.msra.mxu1 %v4758_v3 }
 0x34f   : > { %3723 = vmatprep.subr.mxu1 %v4752_v2 }
 0x350   : > { %3724 = vmatpush3.msra.mxu1 %v4752_v2 }
 0x351   : > { %3779 = vmatpush3.xpose.msk.msra.mxu0 %vm1254_vm1, %v4602_v21  ;;  %3725 = vmatprep.subr.mxu1 %v4744_v0 }
 0x352   : > { %3780 = vmatprep.subr.msk.mxu0 %vm1254_vm1, %v4600_v20  ;;  %3726 = vmatpush3.msra.mxu1 %v4744_v0 }
 0x353   : > { %3727 = vmatprep.subr.mxu1 %v4734_v62 }
 0x354   : > { %3728 = vmatpush3.msra.mxu1 %v4734_v62 }
 0x355   : > { %3781 = vmatpush3.xpose.msk.msra.mxu0 %vm1254_vm1, %v4600_v20  ;;  %3729 = vmatprep.subr.mxu1 %v4722_v59 }
 0x356   : > { %3782 = vmatprep.subr.msk.mxu0 %vm1254_vm1, %v4598_v19  ;;  %3730 = vmatpush3.msra.mxu1 %v4722_v59 }
 0x357   : > { %3731 = vmatprep.subr.mxu1 %v4714_v53 }
 0x358   : > { %3732 = vmatpush3.msra.mxu1 %v4714_v53 }
 0x359   : > { %3783 = vmatpush3.xpose.msk.msra.mxu0 %vm1254_vm1, %v4598_v19  ;;  %3733 = vmatprep.subr.mxu1 %v4706_v51 }
 0x35a   : > { %3784 = vmatprep.subr.msk.mxu0 %vm1254_vm1, %v4596_v18  ;;  %3734 = vmatpush3.msra.mxu1 %v4706_v51 }
 0x35b   : > { %3736 = vmatmul.mubr.msk.f32.vlgmr.msra.gmra.mxu1 %vm767_vm0, %v666_v11  ;;  %3757 = vmatprep.subr.mxu1 %v4804_v10 }
 0x35c   : > { %3758 = vmatpush3.msra.mxu1 %v4804_v10  ;;  %3773 = vmatprep.mubr.msk.f32.mxu1 %vm767_vm0, %v669_v12 }
 0x35d   : > { %3785 = vmatpush3.xpose.msk.msra.mxu0 %vm1254_vm1, %v4596_v18  ;;  %3759 = vmatprep.subr.mxu1 %v4792_v9 }
 0x35e   : > { %3786 = vmatprep.subr.msk.mxu0 %vm1254_vm1, %v4594_v17  ;;  %3760 = vmatpush3.msra.mxu1 %v4792_v9 }
 0x35f   : > { %3761 = vmatprep.subr.mxu1 %v4776_v8 }
 0x360   : > { %3762 = vmatpush3.msra.mxu1 %v4776_v8 }
 0x361   : > { %3787 = vmatpush3.xpose.msk.msra.mxu0 %vm1254_vm1, %v4594_v17  ;;  %3763 = vmatprep.subr.mxu1 %v4760_v4 }
 0x362   : > { %3788 = vmatprep.subr.msk.mxu0 %vm1254_vm1, %v4592_v16  ;;  %3764 = vmatpush3.msra.mxu1 %v4760_v4 }
 0x363   : > { %3765 = vmatprep.subr.mxu1 %v4748_v1 }
 0x364   : > { %3766 = vmatpush3.msra.mxu1 %v4748_v1 }
 0x365   : > { %3789 = vmatpush3.xpose.msk.msra.mxu0 %vm1254_vm1, %v4592_v16  ;;  %3767 = vmatprep.subr.mxu1 %v4736_v63 }
 0x366   : > { %3790 = vmatprep.subr.msk.mxu0 %vm1254_vm1, %v4590_v15  ;;  %3768 = vmatpush3.msra.mxu1 %v4736_v63 }
 0x367   : > { %3769 = vmatprep.subr.mxu1 %v4718_v58 }
 0x368   : > { %3770 = vmatpush3.msra.mxu1 %v4718_v58 }
 0x369   : > { %3791 = vmatpush3.xpose.msk.msra.mxu0 %vm1254_vm1, %v4590_v15  ;;  %3771 = vmatprep.subr.mxu1 %v4708_v52 }
 0x36a   : > { %3814 = vmatprep.subr.msk.mxu0 %vm1254_vm1, %v4700_v50  ;;  %3772 = vmatpush3.msra.mxu1 %v4708_v52 }
 0x36b   : > { %3774 = vmatmul.mubr.msk.f32.vlgmr.msra.gmra.mxu1 %vm767_vm0, %v670_v13  ;;  %3795 = vmatprep.subr.msk.mxu1 %vm1254_vm1, %v4648_v34 }
 0x36c   : > { %3796 = vmatpush3.xpose.msk.msra.mxu1 %vm1254_vm1, %v4648_v34 }
 0x36d   : > { %3797 = vmatprep.subr.msk.mxu1 %vm1254_vm1, %v4646_v33 }
 0x370   : > { %3798 = vmatpush3.xpose.msk.msra.mxu1 %vm1254_vm1, %v4646_v33 }
 0x371   : > { %3799 = vmatprep.subr.msk.mxu1 %vm1254_vm1, %v4642_v31 }
 0x374   : > { %3800 = vmatpush3.xpose.msk.msra.mxu1 %vm1254_vm1, %v4642_v31 }
 0x375   : > { %3801 = vmatprep.subr.msk.mxu1 %vm1254_vm1, %v4638_v29 }
 0x378   : > { %3802 = vmatpush3.xpose.msk.msra.mxu1 %vm1254_vm1, %v4638_v29 }
 0x379   : > { %3803 = vmatprep.subr.msk.mxu1 %vm1254_vm1, %v4634_v28 }
 0x37c   : > { %3804 = vmatpush3.xpose.msk.msra.mxu1 %vm1254_vm1, %v4634_v28 }
 0x37d   : > { %3805 = vmatprep.subr.msk.mxu1 %vm1254_vm1, %v4622_v25 }
 0x380   : > { %3806 = vmatpush3.xpose.msk.msra.mxu1 %vm1254_vm1, %v4622_v25 }
 0x381   : > { %3807 = vmatprep.subr.msk.mxu1 %vm1254_vm1, %v4616_v24 }
 0x384   : > { %3808 = vmatpush3.xpose.msk.msra.mxu1 %vm1254_vm1, %v4616_v24 }
 0x385   : > { %3809 = vmatprep.subr.msk.mxu1 %vm1254_vm1, %v4610_v23 }
 0x388   : > { %3810 = vmatpush3.xpose.msk.msra.mxu1 %vm1254_vm1, %v4610_v23 }
 0x389   : > { %3833 = vmatprep.subr.msk.mxu1 %vm1254_vm1, %v4769_v6 }
 0x3bb   : > { %v4890_v14 = vpop.f32.mrf.mxu1 }
 0x3bc   : > { %v1258_v25 = vsel %vm1254_vm1, %v4890_v14, -inf }
 0x3bd   : > { %v840_v15 = vpop.f32.mrf.mxu1 }
 0x3be   : > { %v1255_v20 = vsel %vm1254_vm1, %v840_v15, -inf }
 0x3db   : > { %v3699_v16 = vpop.f32.mrf.mxu1 }
 0x3dc   : > { %v1264_v17 = vsel %vm1254_vm1, %v3699_v16, -inf }
 0x3dd   : > { %1265 = vmax.xlane.f32.xlu1 %v1264_v17  ;;  %v921_v18 = vpop.f32.mrf.mxu1 }
 0x3de   : > { %v1261_v19 = vsel %vm1254_vm1, %v921_v18, -inf }
 0x3df   : > { %1262 = vmax.xlane.f32.xlu0 %v1261_v19 }
 0x3e1   : > { %1256 = vmax.xlane.f32.xlu1 %v1255_v20 }
 0x3fb   : > { %v4899_v26 = vpop.f32.mrf.mxu0 }
 0x3fc   : > { %v1270_v41 = vsel %vm1254_vm1, %v4899_v26, -inf }
 0x3fd   : > { %v1002_v28 = vpop.f32.mrf.mxu0 }
 0x3fe   : > { %v1267_v34 = vsel %vm1254_vm1, %v1002_v28, -inf }
 0x41b   : > { %v3737_v21 = vpop.f32.mrf.mxu1 }
 0x41c   : > { %v1276_v24 = vsel %vm1254_vm1, %v3737_v21, -inf }
 0x41d   : > { %v1083_v22 = vpop.f32.mrf.mxu1 }
 0x41e   : > { %v1273_v23 = vsel %vm1254_vm1, %v1083_v22, -inf }
 0x41f   : > { %1274 = vmax.xlane.f32.xlu0 %v1273_v23  ;;  %v4908_v23 = vpop.f32.mrf.mxu0 }
 0x423   : > { %1277 = vmax.xlane.f32.xlu0 %v1276_v24 }
 0x427   : > { %1259 = vmax.xlane.f32.xlu0 %v1258_v25 }
 0x42b   : > { %v3775_v27 = vpop.f32.mrf.mxu1 }
 0x42c   : > { %v1288_v29 = vsel %vm1254_vm1, %v3775_v27, -inf }
 0x42d   : > { %1289 = vmax.xlane.f32.xlu0 %v1288_v29  ;;  %v1245_v31 = vpop.f32.mrf.mxu1  ;;  %v1282_v29 = vsel %vm1254_vm1, %v4908_v23, -inf }
 0x42e   : > { %v1285_v33 = vsel %vm1254_vm1, %v1245_v31, -inf }
 0x42f   : > { %1286 = vmax.xlane.f32.xlu1 %v1285_v33 }
 0x431   : > { %1268 = vmax.xlane.f32.xlu0 %v1267_v34 }
 0x435   : > { %1271 = vmax.xlane.f32.xlu0 %v1270_v41 }
 0x466   : > { %v1266_v42 = vpop.xlane.xlu1 %1265 }
 0x467   : > { %v1294_v60 = vsub.f32 %v3699_v16, %v1266_v42  ;;  %v4914_v16 = vpop.f32.mrf.mxu0 }
 0x468   : > { %v1263_v61 = vpop.xlane.xlu0 %1262 }
 0x469   : > { %v1293_v5 = vsub.f32 %v921_v18, %v1263_v61  ;;  %v1309_v11 = vmul.f32 1.442695, %v1294_v60 }
 0x46a   : > { %v1257_v13 = vpop.xlane.xlu1 %1256 }
 0x46b   : > { %v1307_v12 = vmul.f32 1.442695, %v1293_v5  ;;  %v1291_v17 = vsub.f32 %v840_v15, %v1257_v13  ;;  %v1279_v15 = vsel %vm1254_vm1, %v4914_v16, -inf }
 0x46d   : > { %4014 = vpow2.f32 %v1307_v12  ;;  %v1303_v19 = vmul.f32 1.442695, %v1291_v17 }
 0x46e   : > { %4016 = vpow2.f32 %v1309_v11 }
 0x46f   : > { %4018 = vpow2.f32 %v1303_v19 }
 0x47a   : > { %v4906_v20 = vpop.eup %4014 }
 0x47b   : > { %v1333_v24 = vsel %vm1254_vm1, %v4906_v20, 0.0  ;;  %v4912_v25 = vpop.eup %4016 }
 0x47c   : > { %1334 = vadd.xlane.f32.xlu1 %v1333_v24  ;;  %v1336_v18 = vsel %vm1254_vm1, %v4912_v25, 0.0  ;;  %v4922_v33 = vpop.eup %4018 }
 0x47d   : > { %v1327_v34 = vsel %vm1254_vm1, %v4922_v33, 0.0 }
 0x480   : > { %1337 = vadd.xlane.f32.xlu1 %v1336_v18 }
 0x484   : > { %1280 = vmax.xlane.f32.xlu1 %v1279_v15 }
 0x488   : > { %1283 = vmax.xlane.f32.xlu1 %v1282_v29 }
 0x48c   : > { %1328 = vadd.xlane.f32.xlu1 %v1327_v34 }
 0x4a8   : > { %v1275_v41 = vpop.xlane.xlu0 %1274 }
 0x4a9   : > { %v1297_v42 = vsub.f32 %v1083_v22, %v1275_v41 }
 0x4ab   : > { %v1315_v60 = vmul.f32 1.442695, %v1297_v42 }
 0x4ac   : > { %v1278_v61 = vpop.xlane.xlu0 %1277 }
 0x4ad   : > { %4020 = vpow2.f32 %v1315_v60  ;;  %v1298_v5 = vsub.f32 %v3737_v21, %v1278_v61 }
 0x4af   : > { %v1317_v11 = vmul.f32 1.442695, %v1298_v5 }
 0x4b0   : > { %v1260_v12 = vpop.xlane.xlu0 %1259 }
 0x4b1   : > { %4022 = vpow2.f32 %v1317_v11  ;;  %v1292_v13 = vsub.f32 %v4890_v14, %v1260_v12 }
 0x4b3   : > { %v1305_v17 = vmul.f32 1.442695, %v1292_v13 }
 0x4b5   : > { %4024 = vpow2.f32 %v1305_v17 }
 0x4b6   : > { %v1290_v19 = vpop.xlane.xlu0 %1289 }
 0x4b7   : > { %v1302_v24 = vsub.f32 %v3775_v27, %v1290_v19 }
 0x4b8   : > { %v1287_v18 = vpop.xlane.xlu1 %1286 }
 0x4b9   : > { %v1325_v15 = vmul.f32 1.442695, %v1302_v24  ;;  %v1301_v29 = vsub.f32 %v1245_v31, %v1287_v18 }
 0x4ba   : > { %v4927_v54 = vpop.eup %4020  ;;  %v1269_v34 = vpop.xlane.xlu0 %1268 }
 0x4bb   : > { %4026 = vpow2.f32 %v1325_v15  ;;  %v1323_v22 = vmul.f32 1.442695, %v1301_v29  ;;  %v1295_v41 = vsub.f32 %v1002_v28, %v1269_v34  ;;  %v1345_v21 = vsel %vm1254_vm1, %v4927_v54, 0.0 }
 0x4bc   : > { %1346 = vadd.xlane.f32.xlu0 %v1345_v21 }
 0x4bd   : > { %4028 = vpow2.f32 %v1323_v22  ;;  %v1311_v42 = vmul.f32 1.442695, %v1295_v41 }
 0x4be   : > { %v4931_v14 = vpop.eup %4022  ;;  %v1272_v60 = vpop.xlane.xlu0 %1271 }
 0x4bf   : > { %4030 = vpow2.f32 %v1311_v42  ;;  %v1296_v27 = vsub.f32 %v4899_v26, %v1272_v60  ;;  %v1348_v31 = vsel %vm1254_vm1, %v4931_v14, 0.0 }
 0x4c0   : > { %1349 = vadd.xlane.f32.xlu0 %v1348_v31 }
 0x4c1   : > { %v1313_v61 = vmul.f32 1.442695, %v1296_v27 }
 0x4c2   : > { %v4936_v5 = vpop.eup %4024 }
 0x4c3   : > { %4032 = vpow2.f32 %v1313_v61  ;;  %v1330_v28 = vsel %vm1254_vm1, %v4936_v5, 0.0 }
 0x4c4   : > { %1331 = vadd.xlane.f32.xlu0 %v1330_v28 }
 0x4c8   : > { %v4940_v11 = vpop.eup %4026 }
 0x4c9   : > { %v1360_v12 = vsel %vm1254_vm1, %v4940_v11, 0.0 }
 0x4ca   : > { %v4944_v13 = vpop.eup %4028  ;;  %1361 = vadd.xlane.f32.xlu0 %v1360_v12 }
 0x4cb   : > { %v1357_v26 = vsel %vm1254_vm1, %v4944_v13, 0.0 }
 0x4cc   : > { %v4948_v17 = vpop.eup %4030  ;;  %1358 = vadd.xlane.f32.xlu1 %v1357_v26 }
 0x4cd   : > { %v1339_v19 = vsel %vm1254_vm1, %v4948_v17, 0.0 }
 0x4d0   : > { %v4952_v24 = vpop.eup %4032  ;;  %1340 = vadd.xlane.f32.xlu1 %v1339_v19 }
 0x4d1   : > { %v1342_v18 = vsel %vm1254_vm1, %v4952_v24, 0.0 }
 0x4d2   : > { %1343 = vadd.xlane.f32.xlu0 %v1342_v18 }
 0x505   : > { %v1335_v15 = vpop.xlane.xlu1 %1334 }
 0x506   : > { %4034 = vrcp.f32 %v1335_v15  ;;  %v2072_v15 = vld [vmem:[%s6077_s5 + $0xc8] sm:$0xff] }
 0x509   : > { %v1338_v29 = vpop.xlane.xlu1 %1337 }
 0x50a   : > { %4036 = vrcp.f32 %v1338_v29  ;;  %v2071_v29 = vld [vmem:[%s6077_s5 + $0xc0] sm:$0xff] }
 0x50d   : > { %v1281_v34 = vpop.xlane.xlu1 %1280 }
 0x50e   : > { %v1299_v22 = vsub.f32 %v4914_v16, %v1281_v34  ;;  %v2069_v34 = vld [vmem:[%s6077_s5 + $0xb0] sm:$0xff] }
 0x510   : > { %v1319_v41 = vmul.f32 1.442695, %v1299_v22  ;;  %v2068_v22 = vld [vmem:[%s6077_s5 + $0xa8] sm:$0xff] }
 0x511   : > { %v1284_v21 = vpop.xlane.xlu1 %1283 }
 0x512   : > { %4038 = vpow2.f32 %v1319_v41  ;;  %v1300_v42 = vsub.f32 %v4908_v23, %v1284_v21  ;;  %v2066_v41 = vld [vmem:[%s6077_s5 + $0x98] sm:$0xff]  ;;  %v2065_v21 = vld [vmem:[%s6077_s5 + $0x90] sm:$0xff] }
 0x513   : > { %v4035_v60 = vpop.eup %4034 }
 0x514   : > { %v1321_v27 = vmul.f32 1.442695, %v1300_v42  ;;  %v1377_v31 = vmul.f32 %v4035_v60, %v4906_v20  ;;  %v2063_v42 = vld [vmem:[%s6077_s5 + $0x80] sm:$0xff]  ;;  %v2062_v60 = vld [vmem:[%s6077_s5 + $0x78] sm:$0xff] }
 0x515   : > { %v1329_v61 = vpop.xlane.xlu1 %1328 }
 0x516   : > { %4040 = vpow2.f32 %v1321_v27  ;;  %3811 = vmatprep.mubr.msk.f32.mxu1 %vm1254_vm1, %v1377_v31  ;;  %v2060_v27 = vld [vmem:[%s6077_s5 + $0x68] sm:$0xff]  ;;  %v2059_v31 = vld [vmem:[%s6077_s5 + $0x60] sm:$0xff] }
 0x517   : > { %v4037_v28 = vpop.eup %4036  ;;  %4042 = vrcp.f32 %v1329_v61  ;;  %v2057_v61 = vld [vmem:[%s6077_s5 + $0x50] sm:$0xff] }
 0x518   : > { %v1378_v12 = vmul.f32 %v4037_v28, %v4912_v25  ;;  %v2056_v28 = vld [vmem:[%s6077_s5 + $0x48] sm:$0xff] }
 0x51a   : > { %3812 = vmatmul.mubr.msk.f32.vlgmr.msra.gmra.mxu1 %vm1254_vm1, %v1378_v12  ;;  %v2054_v12 = vld [vmem:[%s6077_s5 + $0x38] sm:$0xff] }
 0x51b   : > { %3834 = vmatpush3.xpose.msk.msra.mxu1 %vm1254_vm1, %v4769_v6 }
 0x51c   : > { %3835 = vmatprep.subr.msk.mxu1 %vm1254_vm1, %v4758_v3 }
 0x51f   : > { %v4966_v23 = vpop.eup %4038  ;;  %3836 = vmatpush3.xpose.msk.msra.mxu1 %vm1254_vm1, %v4758_v3 }
 0x520   : > { %3837 = vmatprep.subr.msk.mxu1 %vm1254_vm1, %v4752_v2  ;;  %v1351_v20 = vsel %vm1254_vm1, %v4966_v23, 0.0 }
 0x521   : > { %1352 = vadd.xlane.f32.xlu1 %v1351_v20  ;;  %v2051_v20 = vld [vmem:[%s6077_s5 + $0x20] sm:$0xff] }
 0x523   : > { %v4974_v25 = vpop.eup %4040  ;;  %3838 = vmatpush3.xpose.msk.msra.mxu1 %vm1254_vm1, %v4752_v2 }
 0x524   : > { %v4043_v6 = vpop.eup %4042  ;;  %3839 = vmatprep.subr.msk.mxu1 %vm1254_vm1, %v4744_v0  ;;  %v1354_v16 = vsel %vm1254_vm1, %v4974_v25, 0.0 }
 0x525   : > { %1355 = vadd.xlane.f32.xlu0 %v1354_v16  ;;  %v1375_v3 = vmul.f32 %v4043_v6, %v4922_v33  ;;  %v2048_v6 = vld [vmem:[%s6077_s5 + $0x8] sm:$0xff]  ;;  %v2047_v16 = vld [vmem:[%s6077_s5] sm:$0xff] }
 0x527   : > { %3792 = vmatprep.mubr.msk.f32.mxu0 %vm1254_vm1, %v1375_v3  ;;  %3840 = vmatpush3.xpose.msk.msra.mxu1 %vm1254_vm1, %v4744_v0  ;;  %v2141_v3 = vld [vmem:[%s6077_s5 + $0x2f0] sm:$0xff] }
 0x528   : > { %3841 = vmatprep.subr.msk.mxu1 %vm1254_vm1, %v4734_v62 }
 0x52b   : > { %3842 = vmatpush3.xpose.msk.msra.mxu1 %vm1254_vm1, %v4734_v62 }
 0x52c   : > { %3843 = vmatprep.subr.msk.mxu1 %vm1254_vm1, %v4722_v59 }
 0x52f   : > { %3844 = vmatpush3.xpose.msk.msra.mxu1 %vm1254_vm1, %v4722_v59 }
 0x530   : > { %3845 = vmatprep.subr.msk.mxu1 %vm1254_vm1, %v4714_v53 }
 0x533   : > { %3846 = vmatpush3.xpose.msk.msra.mxu1 %vm1254_vm1, %v4714_v53 }
 0x534   : > { %3847 = vmatprep.subr.msk.mxu1 %vm1254_vm1, %v4706_v51 }
 0x537   : > { %3848 = vmatpush3.xpose.msk.msra.mxu1 %vm1254_vm1, %v4706_v51 }
 0x538   : > { %3871 = vmatprep.subr.msk.mxu1 %vm1254_vm1, %v4804_v10 }
 0x545   : > { %v1347_v62 = vpop.xlane.xlu0 %1346 }
 0x546   : > { %4044 = vrcp.f32 %v1347_v62  ;;  %v2140_v62 = vld [vmem:[%s6077_s5 + $0x2e8] sm:$0xff] }
 0x549   : > { %v1350_v0 = vpop.xlane.xlu0 %1349 }
 0x54a   : > { %4046 = vrcp.f32 %v1350_v0  ;;  %v2138_v0 = vld [vmem:[%s6077_s5 + $0x2d8] sm:$0xff] }
 0x54d   : > { %v1332_v59 = vpop.xlane.xlu0 %1331 }
 0x54e   : > { %4048 = vrcp.f32 %v1332_v59  ;;  %v2137_v59 = vld [vmem:[%s6077_s5 + $0x2d0] sm:$0xff] }
 0x553   : > { %v4045_v2 = vpop.eup %4044 }
 0x554   : > { %v1381_v33 = vmul.f32 %v4045_v2, %v4927_v54  ;;  %v2135_v2 = vld [vmem:[%s6077_s5 + $0x2c0] sm:$0xff] }
 0x555   : > { %v1359_v26 = vpop.xlane.xlu1 %1358 }
 0x556   : > { %4050 = vrcp.f32 %v1359_v26  ;;  %3849 = vmatprep.mubr.msk.f32.mxu1 %vm1254_vm1, %v1381_v33  ;;  %v2134_v33 = vld [vmem:[%s6077_s5 + $0x2b8] sm:$0xff]  ;;  %v2132_v26 = vld [vmem:[%s6077_s5 + $0x2a8] sm:$0xff] }
 0x557   : > { %v4047_v53 = vpop.eup %4046 }
 0x558   : > { %v1382_v19 = vmul.f32 %v4047_v53, %v4931_v14  ;;  %v2131_v53 = vld [vmem:[%s6077_s5 + $0x2a0] sm:$0xff] }
 0x559   : > { %v1341_v51 = vpop.xlane.xlu1 %1340 }
 0x55a   : > { %4052 = vrcp.f32 %v1341_v51  ;;  %3850 = vmatmul.mubr.msk.f32.vlgmr.msra.gmra.mxu1 %vm1254_vm1, %v1382_v19  ;;  %v2129_v19 = vld [vmem:[%s6077_s5 + $0x290] sm:$0xff]  ;;  %v2128_v51 = vld [vmem:[%s6077_s5 + $0x288] sm:$0xff] }
 0x55b   : > { %v4049_v18 = vpop.eup %4048  ;;  %3872 = vmatpush3.xpose.msk.msra.mxu1 %vm1254_vm1, %v4804_v10 }
 0x55c   : > { %3873 = vmatprep.subr.msk.mxu1 %vm1254_vm1, %v4792_v9  ;;  %v1376_v54 = vmul.f32 %v4049_v18, %v4936_v5  ;;  %v2080_v5 = vld [vmem:[%s6077_s5 + $0x108] sm:$0xff]  ;;  %v2126_v18 = vld [vmem:[%s6077_s5 + $0x278] sm:$0xff] }
 0x55e   : > { %3793 = vmatmul.mubr.msk.f32.vlgmr.msra.gmra.mxu0 %vm1254_vm1, %v1376_v54  ;;  %v2125_v54 = vld [vmem:[%s6077_s5 + $0x270] sm:$0xff] }
 0x55f   : > { %3815 = vmatpush3.xpose.msk.msra.mxu0 %vm1254_vm1, %v4700_v50  ;;  %3874 = vmatpush3.xpose.msk.msra.mxu1 %vm1254_vm1, %v4792_v9  ;;  %v1362_v9 = vpop.xlane.xlu0 %1361 }
 0x560   : > { %3816 = vmatprep.subr.msk.mxu0 %vm1254_vm1, %v4696_v48  ;;  %3875 = vmatprep.subr.msk.mxu1 %vm1254_vm1, %v4776_v8  ;;  %4054 = vrcp.f32 %v1362_v9  ;;  %v2120_v9 = vld [vmem:[%s6077_s5 + $0x248] sm:$0xff] }
 0x563   : > { %v4051_v10 = vpop.eup %4050  ;;  %3817 = vmatpush3.xpose.msk.msra.mxu0 %vm1254_vm1, %v4696_v48  ;;  %3876 = vmatpush3.xpose.msk.msra.mxu1 %vm1254_vm1, %v4776_v8  ;;  %v1344_v8 = vpop.xlane.xlu0 %1343 }
 0x564   : > { %3818 = vmatprep.subr.msk.mxu0 %vm1254_vm1, %v4692_v46  ;;  %3877 = vmatprep.subr.msk.mxu1 %vm1254_vm1, %v4760_v4  ;;  %v1385_v50 = vmul.f32 %v4051_v10, %v4944_v13  ;;  %4056 = vrcp.f32 %v1344_v8  ;;  %v2077_v13 = vld [vmem:[%s6077_s5 + $0xf0] sm:$0xff]  ;;  %v2123_v10 = vld [vmem:[%s6077_s5 + $0x260] sm:$0xff]  ;;  %v2116_v8 = vld [vmem:[%s6077_s5 + $0x228] sm:$0xff] }
 0x566   : > { %3887 = vmatprep.mubr.msk.f32.mxu1 %vm1254_vm1, %v1385_v50  ;;  %v2122_v50 = vld [vmem:[%s6077_s5 + $0x258] sm:$0xff] }
 0x567   : > { %v4053_v14 = vpop.eup %4052  ;;  %3819 = vmatpush3.xpose.msk.msra.mxu0 %vm1254_vm1, %v4692_v46  ;;  %3878 = vmatpush3.xpose.msk.msra.mxu1 %vm1254_vm1, %v4760_v4  ;;  %v2081_v4 = vld [vmem:[%s6077_s5 + $0x110] sm:$0xff] }
 0x568   : > { %3820 = vmatprep.subr.msk.mxu0 %vm1254_vm1, %v4690_v45  ;;  %3879 = vmatprep.subr.msk.mxu1 %vm1254_vm1, %v4748_v1  ;;  %v1379_v48 = vmul.f32 %v4053_v14, %v4948_v17  ;;  %v2075_v17 = vld [vmem:[%s6077_s5 + $0xe0] sm:$0xff] }
 0x569   : > { %v2119_v14 = vld [vmem:[%s6077_s5 + $0x240] sm:$0xff] }
 0x56a   : > { %3830 = vmatprep.mubr.msk.f32.mxu0 %vm1254_vm1, %v1379_v48  ;;  %v2117_v48 = vld [vmem:[%s6077_s5 + $0x230] sm:$0xff] }
 0x56b   : > { %3821 = vmatpush3.xpose.msk.msra.mxu0 %vm1254_vm1, %v4690_v45  ;;  %3880 = vmatpush3.xpose.msk.msra.mxu1 %vm1254_vm1, %v4748_v1  ;;  %v2083_v1 = vld [vmem:[%s6077_s5 + $0x120] sm:$0xff] }
 0x56c   : > { %3822 = vmatprep.subr.msk.mxu0 %vm1254_vm1, %v4684_v43  ;;  %3881 = vmatprep.subr.msk.mxu1 %vm1254_vm1, %v4736_v63 }
 0x56f   : > { %3823 = vmatpush3.xpose.msk.msra.mxu0 %vm1254_vm1, %v4684_v43  ;;  %3882 = vmatpush3.xpose.msk.msra.mxu1 %vm1254_vm1, %v4736_v63  ;;  %v4055_v43 = vpop.eup %4054  ;;  %v2084_v63 = vld [vmem:[%s6077_s5 + $0x128] sm:$0xff] }
 0x570   : > { %3824 = vmatprep.subr.msk.mxu0 %vm1254_vm1, %v4670_v39  ;;  %3883 = vmatprep.subr.msk.mxu1 %vm1254_vm1, %v4718_v58 }
 0x571   : > { %v4057_v45 = vpop.eup %4056 }
 0x572   : > { %v1380_v46 = vmul.f32 %v4057_v45, %v4952_v24  ;;  %v2074_v24 = vld [vmem:[%s6077_s5 + $0xd8] sm:$0xff]  ;;  %v2188_v45 = vld [vmem:[%s6077_s5 + $0x468] sm:$0xff] }
 0x573   : > { %3825 = vmatpush3.xpose.msk.msra.mxu0 %vm1254_vm1, %v4670_v39  ;;  %3884 = vmatpush3.xpose.msk.msra.mxu1 %vm1254_vm1, %v4718_v58  ;;  %v1386_v39 = vmul.f32 %v4055_v43, %v4940_v11  ;;  %v2086_v58 = vld [vmem:[%s6077_s5 + $0x138] sm:$0xff] }
 0x574   : > { %3826 = vmatprep.subr.msk.mxu0 %vm1254_vm1, %v4664_v38  ;;  %3885 = vmatprep.subr.msk.mxu1 %vm1254_vm1, %v4708_v52  ;;  %v2078_v11 = vld [vmem:[%s6077_s5 + $0xf8] sm:$0xff] }
 0x575   : > { %v2114_v43 = vld [vmem:[%s6077_s5 + $0x218] sm:$0xff] }
 0x577   : > { %3827 = vmatpush3.xpose.msk.msra.mxu0 %vm1254_vm1, %v4664_v38  ;;  %3886 = vmatpush3.xpose.msk.msra.mxu1 %vm1254_vm1, %v4708_v52  ;;  %v2087_v52 = vld [vmem:[%s6077_s5 + $0x140] sm:$0xff] }
 0x578   : > { %3828 = vmatprep.subr.msk.mxu0 %vm1254_vm1, %v4656_v36 }
 0x57a   : > { %3888 = vmatmul.mubr.msk.f32.vlgmr.msra.gmra.mxu1 %vm1254_vm1, %v1386_v39  ;;  %v2189_v39 = vld [vmem:[%s6077_s5 + $0x470] sm:$0xff] }
 0x57b   : > { %3829 = vmatpush3.xpose.msk.msra.mxu0 %vm1254_vm1, %v4656_v36  ;;  %2268 = vmatprep.subr.mxu1 %v2189_v39 }
 0x57c   : > { %3852 = vmatprep.subr.msk.mxu0 %vm1254_vm1, %v4698_v49  ;;  %2269 = vmatpush1.msra.mxu1 %v2188_v45 }
 0x57e   : > { %3831 = vmatmul.mubr.msk.f32.vlgmr.msra.gmra.mxu0 %vm1254_vm1, %v1380_v46  ;;  %v2113_v46 = vld [vmem:[%s6077_s5 + $0x210] sm:$0xff] }
 0x57f   : > { %3853 = vmatpush3.xpose.msk.msra.mxu0 %vm1254_vm1, %v4698_v49  ;;  %v2089_v49 = vld [vmem:[%s6077_s5 + $0x150] sm:$0xff] }
 0x580   : > { %3854 = vmatprep.subr.msk.mxu0 %vm1254_vm1, %v4694_v47 }
 0x583   : > { %3855 = vmatpush3.xpose.msk.msra.mxu0 %vm1254_vm1, %v4694_v47  ;;  %v2090_v47 = vld [vmem:[%s6077_s5 + $0x158] sm:$0xff] }
 0x584   : > { %3856 = vmatprep.subr.msk.mxu0 %vm1254_vm1, %v4687_v44 }
 0x587   : > { %3857 = vmatpush3.xpose.msk.msra.mxu0 %vm1254_vm1, %v4687_v44 }
 0x588   : > { %3858 = vmatprep.subr.msk.mxu0 %vm1254_vm1, %v4672_v40 }
 0x58b   : > { %3859 = vmatpush3.xpose.msk.msra.mxu0 %vm1254_vm1, %v4672_v40 }
 0x58c   : > { %3860 = vmatprep.subr.msk.mxu0 %vm1254_vm1, %v4660_v37 }
 0x58f   : > { %3861 = vmatpush3.xpose.msk.msra.mxu0 %vm1254_vm1, %v4660_v37 }
 0x590   : > { %3862 = vmatprep.subr.msk.mxu0 %vm1254_vm1, %v4650_v35 }
 0x593   : > { %3863 = vmatpush3.xpose.msk.msra.mxu0 %vm1254_vm1, %v4650_v35 }
 0x594   : > { %3864 = vmatprep.subr.msk.mxu0 %vm1254_vm1, %v4644_v32 }
 0x597   : > { %3865 = vmatpush3.xpose.msk.msra.mxu0 %vm1254_vm1, %v4644_v32  ;;  %v2093_v32 = vld [vmem:[%s6077_s5 + $0x170] sm:$0xff] }
 0x598   : > { %3866 = vmatprep.subr.msk.mxu0 %vm1254_vm1, %v4640_v30 }
 0x59b   : > { %3867 = vmatpush3.xpose.msk.msra.mxu0 %vm1254_vm1, %v4640_v30  ;;  %v2092_v30 = vld [vmem:[%s6077_s5 + $0x168] sm:$0xff] }
 0x59c   : > { %2191 = vmatprep.subr.mxu0 %v2093_v32  ;;  %v2102_v32 = vld [vmem:[%s6077_s5 + $0x1b8] sm:$0xff] }
 0x5aa   : > { %v1353_v36 = vpop.xlane.xlu1 %1352 }
 0x5ab   : > { %4058 = vrcp.f32 %v1353_v36  ;;  %v2111_v36 = vld [vmem:[%s6077_s5 + $0x200] sm:$0xff] }
 0x5ae   : > { %v1356_v37 = vpop.xlane.xlu0 %1355 }
 0x5af   : > { %4060 = vrcp.f32 %v1356_v37  ;;  %v2110_v37 = vld [vmem:[%s6077_s5 + $0x1f8] sm:$0xff] }
 0x5b8   : > { %v4059_v38 = vpop.eup %4058 }
 0x5b9   : > { %v1383_v40 = vmul.f32 %v4059_v38, %v4966_v23  ;;  %v2053_v23 = vld [vmem:[%s6077_s5 + $0x30] sm:$0xff]  ;;  %v2108_v38 = vld [vmem:[%s6077_s5 + $0x1e8] sm:$0xff] }
 0x5bb   : > { %3868 = vmatprep.mubr.msk.f32.mxu0 %vm1254_vm1, %v1383_v40  ;;  %v2107_v40 = vld [vmem:[%s6077_s5 + $0x1e0] sm:$0xff] }
 0x5bc   : > { %v4061_v35 = vpop.eup %4060 }
 0x5bd   : > { %v1384_v44 = vmul.f32 %v4061_v35, %v4974_v25  ;;  %v2050_v25 = vld [vmem:[%s6077_s5 + $0x18] sm:$0xff]  ;;  %v2105_v35 = vld [vmem:[%s6077_s5 + $0x1d0] sm:$0xff] }
 0x5bf   : > { %3869 = vmatmul.mubr.msk.f32.vlgmr.msra.gmra.mxu0 %vm1254_vm1, %v1384_v44  ;;  %v2104_v44 = vld [vmem:[%s6077_s5 + $0x1c8] sm:$0xff] }
 0x5c0   : > { %2192 = vmatpush1.msra.mxu0 %v2092_v30  ;;  %v2101_v30 = vld [vmem:[%s6077_s5 + $0x1b0] sm:$0xff] }
 0x5c1   : > { %2193 = vmatprep.subr.mxu0 %v2090_v47  ;;  %v2186_v47 = vld [vmem:[%s6077_s5 + $0x458] sm:$0xff] }
 0x5c2   : > { %2194 = vmatpush1.msra.mxu0 %v2089_v49  ;;  %2270 = vmatprep.subr.mxu1 %v2186_v47  ;;  %v2099_v49 = vld [vmem:[%s6077_s5 + $0x1a0] sm:$0xff]  ;;  %v2169_v47 = vld [vmem:[%s6077_s5 + $0x3d0] sm:$0xff] }
 0x5c3   : > { %2195 = vmatprep.subr.mxu0 %v2087_v52  ;;  %v2185_v52 = vld [vmem:[%s6077_s5 + $0x450] sm:$0xff] }
 0x5c4   : > { %2196 = vmatpush1.msra.mxu0 %v2086_v58  ;;  %v2098_v58 = vld [vmem:[%s6077_s5 + $0x198] sm:$0xff]  ;;  %2271 = vmatpush1.msra.mxu1 %v2185_v52  ;;  %v2163_v52 = vld [vmem:[%s6077_s5 + $0x3a0] sm:$0xff] }
 0x5c5   : > { %2197 = vmatprep.subr.mxu0 %v2084_v63  ;;  %v2183_v63 = vld [vmem:[%s6077_s5 + $0x440] sm:$0xff] }
 0x5c6   : > { %2198 = vmatpush1.msra.mxu0 %v2083_v1  ;;  %v2096_v1 = vld [vmem:[%s6077_s5 + $0x188] sm:$0xff]  ;;  %2272 = vmatprep.subr.mxu1 %v2183_v63  ;;  %v2157_v63 = vld [vmem:[%s6077_s5 + $0x370] sm:$0xff] }
 0x5c7   : > { %2199 = vmatprep.subr.mxu0 %v2081_v4  ;;  %v2182_v4 = vld [vmem:[%s6077_s5 + $0x438] sm:$0xff] }
 0x5c8   : > { %2200 = vmatpush1.msra.mxu0 %v2080_v5  ;;  %2273 = vmatpush1.msra.mxu1 %v2182_v4  ;;  %v2154_v4 = vld [vmem:[%s6077_s5 + $0x358] sm:$0xff] }
 0x5c9   : > { %2201 = vmatprep.subr.mxu0 %v2078_v11  ;;  %v2095_v11 = vld [vmem:[%s6077_s5 + $0x180] sm:$0xff] }
 0x5ca   : > { %2202 = vmatpush1.msra.mxu0 %v2077_v13  ;;  %v2180_v13 = vld [vmem:[%s6077_s5 + $0x428] sm:$0xff] }
 0x5cb   : > { %2203 = vmatprep.subr.mxu0 %v2075_v17  ;;  %2274 = vmatprep.subr.mxu1 %v2180_v13  ;;  %v2179_v17 = vld [vmem:[%s6077_s5 + $0x420] sm:$0xff] }
 0x5cc   : > { %2204 = vmatpush1.msra.mxu0 %v2074_v24  ;;  %v2177_v24 = vld [vmem:[%s6077_s5 + $0x410] sm:$0xff]  ;;  %2275 = vmatpush1.msra.mxu1 %v2179_v17  ;;  %v2094_v17 = vld [vmem:[%s6077_s5 + $0x178] sm:$0xff] }
 0x5cd   : > { %2205 = vmatprep.subr.mxu0 %v2072_v15  ;;  %v2176_v15 = vld [vmem:[%s6077_s5 + $0x408] sm:$0xff]  ;;  %2276 = vmatprep.subr.mxu1 %v2177_v24 }
 0x5ce   : > { %2206 = vmatpush1.msra.mxu0 %v2071_v29  ;;  %v2174_v29 = vld [vmem:[%s6077_s5 + $0x3f8] sm:$0xff]  ;;  %2277 = vmatpush1.msra.mxu1 %v2176_v15  ;;  %v2139_v15 = vld [vmem:[%s6077_s5 + $0x2e0] sm:$0xff] }
 0x5cf   : > { %2207 = vmatprep.subr.mxu0 %v2069_v34  ;;  %2278 = vmatprep.subr.mxu1 %v2174_v29  ;;  %v2148_v29 = vld [vmem:[%s6077_s5 + $0x328] sm:$0xff] }
 0x5d0   : > { %2208 = vmatpush1.msra.mxu0 %v2068_v22  ;;  %v2173_v22 = vld [vmem:[%s6077_s5 + $0x3f0] sm:$0xff] }
 0x5d1   : > { %2209 = vmatprep.subr.mxu0 %v2066_v41  ;;  %v5347_v41 = vld [vmem:[%s6077_s5 + $0x478] sm:$0xff]  ;;  %2279 = vmatpush1.msra.mxu1 %v2173_v22  ;;  %v2136_v22 = vld [vmem:[%s6077_s5 + $0x2c8] sm:$0xff] }
 0x5d2   : > { %2210 = vmatpush1.msra.mxu0 %v2065_v21  ;;  %v2171_v21 = vld [vmem:[%s6077_s5 + $0x3e0] sm:$0xff] }
 0x5d3   : > { %2211 = vmatprep.subr.mxu0 %v2063_v42  ;;  %2280 = vmatprep.subr.mxu1 %v2171_v21 }
 0x5d4   : > { %2212 = vmatpush1.msra.mxu0 %v2062_v60  ;;  %v2170_v60 = vld [vmem:[%s6077_s5 + $0x3d8] sm:$0xff] }
 0x5d5   : > { %2213 = vmatprep.subr.mxu0 %v2060_v27  ;;  %v2168_v27 = vld [vmem:[%s6077_s5 + $0x3c8] sm:$0xff]  ;;  %2281 = vmatpush1.msra.mxu1 %v2170_v60 }
 0x5d6   : > { %2214 = vmatpush1.msra.mxu0 %v2059_v31  ;;  %2282 = vmatprep.subr.mxu1 %v2168_v27 }
 0x5d7   : > { %2215 = vmatprep.subr.mxu0 %v2057_v61  ;;  %v2167_v61 = vld [vmem:[%s6077_s5 + $0x3c0] sm:$0xff] }
 0x5d8   : > { %2216 = vmatpush1.msra.mxu0 %v2056_v28  ;;  %2283 = vmatpush1.msra.mxu1 %v2167_v61  ;;  %v2085_v61 = vld [vmem:[%s6077_s5 + $0x130] sm:$0xff] }
 0x5d9   : > { %2217 = vmatprep.subr.mxu0 %v2054_v12  ;;  %v2165_v12 = vld [vmem:[%s6077_s5 + $0x3b0] sm:$0xff] }
 0x5da   : > { %2218 = vmatpush1.msra.mxu0 %v2053_v23  ;;  %v5321_v5 = vpop.f32.mrf.mxu1  ;;  %v2164_v23 = vld [vmem:[%s6077_s5 + $0x3a8] sm:$0xff]  ;;  %2284 = vmatprep.subr.mxu1 %v2165_v12 }
 0x5db   : > { %2219 = vmatprep.subr.mxu0 %v2051_v20  ;;  %v2162_v20 = vld [vmem:[%s6077_s5 + $0x398] sm:$0xff]  ;;  %2285 = vmatpush1.msra.mxu1 %v2164_v23 }
 0x5dc   : > { %2220 = vmatpush1.msra.mxu0 %v2050_v25  ;;  %v1588_v34 = vpop.f32.mrf.mxu1  ;;  %v2161_v25 = vld [vmem:[%s6077_s5 + $0x390] sm:$0xff]  ;;  %2286 = vmatprep.subr.mxu1 %v2162_v20  ;;  %v2130_v23 = vld [vmem:[%s6077_s5 + $0x298] sm:$0xff] }
 0x5dd   : > { %2221 = vmatprep.subr.mxu0 %v2048_v6  ;;  %v2159_v6 = vld [vmem:[%s6077_s5 + $0x380] sm:$0xff]  ;;  %2287 = vmatpush1.msra.mxu1 %v2161_v25  ;;  %v2082_v25 = vld [vmem:[%s6077_s5 + $0x118] sm:$0xff] }
 0x5de   : > { %2222 = vmatpush1.msra.mxu0 %v2047_v16  ;;  %v2158_v16 = vld [vmem:[%s6077_s5 + $0x378] sm:$0xff]  ;;  %2288 = vmatprep.subr.mxu1 %v2159_v6 }
 0x5df   : > { %2223 = vmatprep.subr.mxu0 %v2141_v3  ;;  %v2156_v3 = vld [vmem:[%s6077_s5 + $0x368] sm:$0xff]  ;;  %2289 = vmatpush1.msra.mxu1 %v2158_v16  ;;  %v2127_v16 = vld [vmem:[%s6077_s5 + $0x280] sm:$0xff] }
 0x5e0   : > { %2224 = vmatpush2.msra.mxu0 %v2140_v62  ;;  %v2155_v62 = vld [vmem:[%s6077_s5 + $0x360] sm:$0xff]  ;;  %2290 = vmatprep.subr.mxu1 %v2156_v3 }
 0x5e1   : > { %2225 = vmatprep.subr.mxu0 %v2138_v0  ;;  %v2153_v0 = vld [vmem:[%s6077_s5 + $0x350] sm:$0xff]  ;;  %2291 = vmatpush1.msra.mxu1 %v2155_v62  ;;  %v2079_v3 = vld [vmem:[%s6077_s5 + $0x100] sm:$0xff]  ;;  %v2124_v62 = vld [vmem:[%s6077_s5 + $0x268] sm:$0xff] }
 0x5e2   : > { %2226 = vmatpush2.msra.mxu0 %v2137_v59  ;;  %v2152_v59 = vld [vmem:[%s6077_s5 + $0x348] sm:$0xff]  ;;  %2292 = vmatprep.subr.mxu1 %v2153_v0 }
 0x5e3   : > { %2227 = vmatprep.subr.mxu0 %v2135_v2  ;;  %v2150_v2 = vld [vmem:[%s6077_s5 + $0x338] sm:$0xff]  ;;  %2293 = vmatpush1.msra.mxu1 %v2152_v59  ;;  %v2076_v0 = vld [vmem:[%s6077_s5 + $0xe8] sm:$0xff]  ;;  %v2121_v59 = vld [vmem:[%s6077_s5 + $0x250] sm:$0xff] }
 0x5e4   : > { %2228 = vmatpush2.msra.mxu0 %v2134_v33  ;;  %v2149_v33 = vld [vmem:[%s6077_s5 + $0x330] sm:$0xff]  ;;  %2294 = vmatprep.subr.mxu1 %v2150_v2 }
 0x5e5   : > { %2229 = vmatprep.subr.mxu0 %v2132_v26  ;;  %v2147_v26 = vld [vmem:[%s6077_s5 + $0x320] sm:$0xff]  ;;  %2295 = vmatpush1.msra.mxu1 %v2149_v33  ;;  %v2073_v2 = vld [vmem:[%s6077_s5 + $0xd0] sm:$0xff]  ;;  %v2118_v33 = vld [vmem:[%s6077_s5 + $0x238] sm:$0xff] }
 0x5e6   : > { %2230 = vmatpush2.msra.mxu0 %v2131_v53  ;;  %v2146_v53 = vld [vmem:[%s6077_s5 + $0x318] sm:$0xff]  ;;  %2296 = vmatprep.subr.mxu1 %v2147_v26 }
 0x5e7   : > { %2231 = vmatprep.subr.mxu0 %v2129_v19  ;;  %v2144_v19 = vld [vmem:[%s6077_s5 + $0x308] sm:$0xff]  ;;  %2297 = vmatpush1.msra.mxu1 %v2146_v53  ;;  %v2070_v26 = vld [vmem:[%s6077_s5 + $0xb8] sm:$0xff]  ;;  %v2115_v53 = vld [vmem:[%s6077_s5 + $0x220] sm:$0xff] }
 0x5e8   : > { %2232 = vmatpush2.msra.mxu0 %v2128_v51  ;;  %v2143_v51 = vld [vmem:[%s6077_s5 + $0x300] sm:$0xff]  ;;  %2298 = vmatprep.subr.mxu1 %v2144_v19 }
 0x5e9   : > { %2233 = vmatprep.subr.mxu0 %v2126_v18  ;;  %2299 = vmatpush1.msra.mxu1 %v2143_v51  ;;  %v2142_v18 = vld [vmem:[%s6077_s5 + $0x2f8] sm:$0xff]  ;;  %v2067_v19 = vld [vmem:[%s6077_s5 + $0xa0] sm:$0xff]  ;;  %v2112_v51 = vld [vmem:[%s6077_s5 + $0x208] sm:$0xff] }
 0x5ea   : > { %2234 = vmatpush2.msra.mxu0 %v2125_v54  ;;  %v4149_v54 = vmov 0.0   ;;  %3596 = vmatprep.subr.mxu1 %v2142_v18  ;;  %v2064_v18 = vld [vmem:[%s6077_s5 + $0x88] sm:$0xff] }
 0x5eb   : > { %2235 = vmatprep.subr.mxu0 %v2123_v10  ;;  %2332 = vmatprep.mubr.f32.mxu1 %v4149_v54 }
 0x5ec   : > { %2236 = vmatpush2.msra.mxu0 %v2122_v50 }
 0x5ed   : > { %2237 = vmatprep.subr.mxu0 %v2120_v9 }
 0x5ee   : > { %2238 = vmatpush2.msra.mxu0 %v2119_v14 }
 0x5ef   : > { %2239 = vmatprep.subr.mxu0 %v2117_v48 }
 0x5f0   : > { %2240 = vmatpush2.msra.mxu0 %v2116_v8 }
 0x5f1   : > { %2241 = vmatprep.subr.mxu0 %v2114_v43 }
 0x5f2   : > { %2242 = vmatpush2.msra.mxu0 %v2113_v46 }
 0x5f3   : > { %2243 = vmatprep.subr.mxu0 %v2111_v36 }
 0x5f4   : > { %2244 = vmatpush2.msra.mxu0 %v2110_v37 }
 0x5f5   : > { %2245 = vmatprep.subr.mxu0 %v2108_v38  ;;  %v2187_v38 = vld [vmem:[%s6077_s5 + $0x460] sm:$0xff] }
 0x5f6   : > { %2246 = vmatpush2.msra.mxu0 %v2107_v40  ;;  %v2184_v40 = vld [vmem:[%s6077_s5 + $0x448] sm:$0xff] }
 0x5f7   : > { %2247 = vmatprep.subr.mxu0 %v2105_v35  ;;  %v2181_v35 = vld [vmem:[%s6077_s5 + $0x430] sm:$0xff] }
 0x5f8   : > { %2248 = vmatpush2.msra.mxu0 %v2104_v44  ;;  %v2178_v44 = vld [vmem:[%s6077_s5 + $0x418] sm:$0xff] }
 0x5f9   : > { %2249 = vmatprep.subr.mxu0 %v2102_v32  ;;  %v2175_v32 = vld [vmem:[%s6077_s5 + $0x400] sm:$0xff] }
 0x5fa   : > { %2250 = vmatpush2.msra.mxu0 %v2101_v30  ;;  %v2172_v30 = vld [vmem:[%s6077_s5 + $0x3e8] sm:$0xff] }
 0x5fb   : > { %2251 = vmatprep.subr.mxu0 %v2099_v49  ;;  %v2166_v49 = vld [vmem:[%s6077_s5 + $0x3b8] sm:$0xff] }
 0x5fc   : > { %2252 = vmatpush2.msra.mxu0 %v2098_v58  ;;  %v2160_v58 = vld [vmem:[%s6077_s5 + $0x388] sm:$0xff] }
 0x5fd   : > { %2253 = vmatprep.subr.mxu0 %v2096_v1 }
 0x5fe   : > { %2254 = vmatpush2.msra.mxu0 %v2095_v11 }
 0x5ff   : > { %3890 = vmatprep.subr.mxu0 %v5347_v41 }
 0x61a   : > { %v3851_v42 = vpop.f32.mrf.mxu1 }
 0x61b   : > { %v3999_v9 = vpack.i.bf16 %v5321_v5, %v3851_v42  ;;  %v2151_v5 = vld [vmem:[%s6077_s5 + $0x340] sm:$0xff]  ;;  %v2088_v42 = vld [vmem:[%s6077_s5 + $0x148] sm:$0xff] }
 0x61c   : > { %v1798_v31 = vpop.f32.mrf.mxu1 }
 0x61d   : > { %v3994_v28 = vpack.i.bf16 %v1588_v34, %v1798_v31  ;;  %v2091_v34 = vld [vmem:[%s6077_s5 + $0x160] sm:$0xff]  ;;  %v2133_v31 = vld [vmem:[%s6077_s5 + $0x2b0] sm:$0xff] }
 0x61e   : > { %v5419_v14 = vpop.f32.mrf.mxu0 }
 0x61f   : > { %3995 = vrot.lane.b32.xlu0 %v3994_v28, %s4148_s29 }
 0x620   : > { %v1483_v48 = vpop.f32.mrf.mxu0 }
 0x63a   : > { %v3889_v10 = vpop.f32.mrf.mxu1 }
 0x63c   : > { %v2008_v50 = vpop.f32.mrf.mxu1 }
 0x63d   : > { %2035 = vrot.lane.b32.xlu1 %v2008_v50, %s4148_s29  ;;  %v2061_v50 = vld [vmem:[%s6077_s5 + $0x70] sm:$0xff] }
 0x63e   : > { %v5421_v8 = vpop.f32.mrf.mxu0 }
 0x640   : > { %v1693_v46 = vpop.f32.mrf.mxu0 }
 0x641   : > { %4000 = vrot.lane.b32.xlu1 %v3999_v9, %s4148_s29  ;;  %v2106_v9 = vld [vmem:[%s6077_s5 + $0x1d8] sm:$0xff] }
 0x645   : > { %2037 = vrot.lane.b32.xlu1 %v3889_v10, %s4148_s29  ;;  %v2109_v10 = vld [vmem:[%s6077_s5 + $0x1f0] sm:$0xff]  ;;  %s4086_s29 = scalar_lea.vmem %s6025_s11, 768 }
 0x646   : > { %p4087_p11 = scmp.ne.s32.totalorder %s6025_s11, %s4086_s29  ;;  %p4094_p1 = scmp.lt.s32.totalorder %s4092_s20, %s4086_s29 }
 0x648   : > { %p4088_p12 = pnand %p4087_p11, %p4250_p5  ;;  %p4095_p2 = por %p4094_p1, %p4093_p0 }
 0x64a   : > { %p4089_p13 = pneg %p4088_p12 }
 0x64c   : > { %p4096_p3 = pnand %p4095_p2, %p4089_p13 }
 0x67f   : > { %v3870_v1 = vpop.f32.mrf.mxu0 }
 0x681   : > { %v1903_v11 = vpop.f32.mrf.mxu0 }
 0x691   : > { %v3996_v43 = vpop.permute.xlu0 %3995 }
 0x692   : > { %v3998_v39 = vunpack.i.h.bf16 %v3996_v43  ;;  %v3997_v45 = vunpack.i.l.bf16 %v3996_v43  ;;  %v2100_v43 = vld [vmem:[%s6077_s5 + $0x1a8] sm:$0xff] }
 0x694   : > { %v5424_v36 = vsel %vm767_vm0, %v1693_v46, %v3997_v45  ;;  %v5427_v37 = vsel %vm767_vm0, %v1483_v48, %v3998_v39  ;;  %v2103_v48 = vld [vmem:[%s6077_s5 + $0x1c0] sm:$0xff]  ;;  %v2052_v39 = vld [vmem:[%s6077_s5 + $0x28] sm:$0xff]  ;;  %v2097_v45 = vld [vmem:[%s6077_s5 + $0x190] sm:$0xff] }
 0x695   : > { %2255 = vmatprep.mubr.f32.mxu0 %v5424_v36  ;;  %v2049_v46 = vld [vmem:[%s6077_s5 + $0x10] sm:$0xff] }
 0x696   : > { %2256 = vmatmul.mubr.f32.vlgmr.msra.gmra.mxu0 %v5427_v37 }
 0x697   : > { %3891 = vmatpush3.msra.mxu0 %v5347_v41  ;;  %v2145_v41 = vld [vmem:[%s6077_s5 + $0x310] sm:$0xff] }
 0x698   : > { %3892 = vmatprep.subr.mxu0 %v2187_v38 }
 0x699   : > { %3893 = vmatpush3.msra.mxu0 %v2187_v38 }
 0x69a   : > { %3894 = vmatprep.subr.mxu0 %v2184_v40 }
 0x69b   : > { %3895 = vmatpush3.msra.mxu0 %v2184_v40 }
 0x69c   : > { %3896 = vmatprep.subr.mxu0 %v2181_v35 }
 0x69d   : > { %3897 = vmatpush3.msra.mxu0 %v2181_v35 }
 0x69e   : > { %3898 = vmatprep.subr.mxu0 %v2178_v44 }
 0x69f   : > { %3899 = vmatpush3.msra.mxu0 %v2178_v44 }
 0x6a0   : > { %3900 = vmatprep.subr.mxu0 %v2175_v32 }
 0x6a1   : > { %3901 = vmatpush3.msra.mxu0 %v2175_v32 }
 0x6a2   : > { %3902 = vmatprep.subr.mxu0 %v2172_v30 }
 0x6a3   : > { %3903 = vmatpush3.msra.mxu0 %v2172_v30 }
 0x6a4   : > { %3904 = vmatprep.subr.mxu0 %v2169_v47 }
 0x6a5   : > { %3905 = vmatpush3.msra.mxu0 %v2169_v47 }
 0x6a6   : > { %3906 = vmatprep.subr.mxu0 %v2166_v49 }
 0x6a7   : > { %3907 = vmatpush3.msra.mxu0 %v2166_v49 }
 0x6a8   : > { %3908 = vmatprep.subr.mxu0 %v2163_v52 }
 0x6a9   : > { %3909 = vmatpush3.msra.mxu0 %v2163_v52 }
 0x6aa   : > { %3910 = vmatprep.subr.mxu0 %v2160_v58 }
 0x6ab   : > { %3911 = vmatpush3.msra.mxu0 %v2160_v58 }
 0x6ac   : > { %3912 = vmatprep.subr.mxu0 %v2157_v63 }
 0x6ad   : > { %3913 = vmatpush3.msra.mxu0 %v2157_v63 }
 0x6ae   : > { %3914 = vmatprep.subr.mxu0 %v2154_v4 }
 0x6af   : > { %v2036_v13 = vpop.permute.xlu1 %2035  ;;  %3915 = vmatpush3.msra.mxu0 %v2154_v4  ;;  %v2497_v4 = vld [vmem:[%s6078_s6 + $0x10] sm:$0xff] }
 0x6b0   : > { %v2045_v24 = vsel %vm767_vm0, %v1903_v11, %v2036_v13  ;;  %3916 = vmatprep.subr.mxu0 %v2151_v5  ;;  %v2499_v11 = vld [vmem:[%s6078_s6 + $0x20] sm:$0xff] }
 0x6b1   : > { %2333 = vmatmul.mubr.f32.vlgmr.msra.gmra.mxu1 %v2045_v24  ;;  %3917 = vmatpush3.msra.mxu0 %v2151_v5  ;;  %v2498_v5 = vld [vmem:[%s6078_s6 + $0x18] sm:$0xff] }
 0x6b2   : > { %3597 = vmatpush3.msra.mxu1 %v2094_v17  ;;  %2338 = vmatprep.mubr.f32.mxu1 %v4149_v54 }
 0x6b3   : > { %3598 = vmatprep.subr.mxu1 %v2139_v15  ;;  %v4001_v21 = vpop.permute.xlu1 %4000  ;;  %3918 = vmatprep.subr.mxu0 %v2148_v29 }
 0x6b4   : > { %3599 = vmatpush3.msra.mxu1 %v2091_v34  ;;  %v4003_v60 = vunpack.i.h.bf16 %v4001_v21  ;;  %v4002_v27 = vunpack.i.l.bf16 %v4001_v21  ;;  %3919 = vmatpush3.msra.mxu0 %v2148_v29 }
 0x6b5   : > { %3600 = vmatprep.subr.mxu1 %v2136_v22  ;;  %3920 = vmatprep.subr.mxu0 %v2145_v41  ;;  %v2501_v22 = vld [vmem:[%s6078_s6 + $0x30] sm:$0xff] }
 0x6b6   : > { %3601 = vmatpush3.msra.mxu1 %v2088_v42  ;;  %v2044_v28 = vsel %vm767_vm0, %v5421_v8, %v4002_v27  ;;  %v2042_v12 = vsel %vm767_vm0, %v5419_v14, %v4003_v60  ;;  %3921 = vmatpush3.msra.mxu0 %v2145_v41  ;;  %v2058_v14 = vld [vmem:[%s6077_s5 + $0x58] sm:$0xff]  ;;  %v2055_v8 = vld [vmem:[%s6077_s5 + $0x40] sm:$0xff] }
 0x6b7   : > { %3602 = vmatprep.subr.mxu1 %v2133_v31  ;;  %v2038_v20 = vpop.permute.xlu1 %2037  ;;  %2261 = vmatprep.mubr.f32.mxu0 %v2044_v28  ;;  %v2502_v31 = vld [vmem:[%s6078_s6 + $0x38] sm:$0xff] }
 0x6b8   : > { %3603 = vmatpush3.msra.mxu1 %v2085_v61  ;;  %2262 = vmatmul.mubr.f32.gmra.mxu0 %v2042_v12  ;;  %v2046_v6 = vsel %vm767_vm0, %v3870_v1, %v2038_v20  ;;  %v2496_v1 = vld [vmem:[%s6078_s6 + $0x8] sm:$0xff] }
 0x6b9   : > { %3604 = vmatprep.subr.mxu1 %v2130_v23  ;;  %2339 = vmatmul.mubr.f32.gmra.mxu1 %v2046_v6 }
 0x6ba   : > { %3605 = vmatpush3.msra.mxu1 %v2082_v25  ;;  %3922 = vmatprep.mubr.f32.mxu0 %v2045_v24  ;;  %v2500_v24 = vld [vmem:[%s6078_s6 + $0x28] sm:$0xff] }
 0x6bb   : > { %3606 = vmatprep.subr.mxu1 %v2127_v16  ;;  %2409 = vmatprep.mubr.f32.mxu1 %v5424_v36  ;;  %v2495_v36 = vld [vmem:[%s6078_s6] sm:$0xff] }
 0x6bc   : > { %3607 = vmatpush3.msra.mxu1 %v2079_v3  ;;  %3923 = vmatmul.mubr.f32.vlgmr.msra.gmra.mxu0 %v2046_v6 }
 0x6bd   : > { %3608 = vmatprep.subr.mxu1 %v2124_v62  ;;  %3929 = vmatprep.mubr.msk.f32.mxu0 %vm2503_vm2, %v2495_v36 }
 0x6be   : > { %3609 = vmatpush3.msra.mxu1 %v2076_v0 }
 0x6bf   : > { %3610 = vmatprep.subr.mxu1 %v2121_v59 }
 0x6c0   : > { %3611 = vmatpush3.msra.mxu1 %v2073_v2 }
 0x6c1   : > { %3612 = vmatprep.subr.mxu1 %v2118_v33 }
 0x6c2   : > { %3613 = vmatpush3.msra.mxu1 %v2070_v26 }
 0x6c3   : > { %3614 = vmatprep.subr.mxu1 %v2115_v53 }
 0x6c4   : > { %3615 = vmatpush3.msra.mxu1 %v2067_v19 }
 0x6c5   : > { %3616 = vmatprep.subr.mxu1 %v2112_v51 }
 0x6c6   : > { %3617 = vmatpush3.msra.mxu1 %v2064_v18 }
 0x6c7   : > { %3618 = vmatprep.subr.mxu1 %v2109_v10 }
 0x6c8   : > { %3619 = vmatpush3.msra.mxu1 %v2061_v50 }
 0x6c9   : > { %3620 = vmatprep.subr.mxu1 %v2106_v9 }
 0x6ca   : > { %3621 = vmatpush3.msra.mxu1 %v2058_v14 }
 0x6cb   : > { %3622 = vmatprep.subr.mxu1 %v2103_v48 }
 0x6cc   : > { %3623 = vmatpush3.msra.mxu1 %v2055_v8 }
 0x6cd   : > { %3624 = vmatprep.subr.mxu1 %v2100_v43 }
 0x6ce   : > { %3625 = vmatpush3.msra.mxu1 %v2052_v39 }
 0x6cf   : > { %3626 = vmatprep.subr.mxu1 %v2097_v45 }
 0x6d0   : > { %3627 = vmatpush3.msra.mxu1 %v2049_v46 }
 0x6d1   : > { %2410 = vmatmul.mubr.f32.vlgmr.msra.gmra.mxu1 %v5427_v37 }
 0x6d2   : > { %2414 = vmatprep.mubr.f32.mxu1 %v2044_v28 }
 0x6d5   : > { %2415 = vmatmul.mubr.f32.gmra.mxu1 %v2042_v12 }
 0x6d6   : > { %2592 = vmatprep.mubr.f32.mxu1 %v4149_v54 }
 0x756   : > { %v2257_v38 = vpop.f32.mrf.mxu0 }
 0x758   : > { %v2259_v35 = vpop.f32.mrf.mxu0 }
 0x771   : > { %v2334_v40 = vpop.f32.mrf.mxu1 }
 0x772   : > { %v2335_v63 = vadd.f32 %v2334_v40, %v2257_v38 }
 0x773   : > { %v2336_v44 = vpop.f32.mrf.mxu1 }
 0x774   : > { %v2337_v58 = vadd.f32 %v2336_v44, %v2259_v35 }
 0x778   : > { %v2263_v32 = vpop.f32.mrf.mxu0 }
 0x779   : > { %v2340_v30 = vpop.f32.mrf.mxu1 }
 0x77a   : > { %v2265_v47 = vpop.f32.mrf.mxu0  ;;  %v2341_v52 = vadd.f32 %v2340_v30, %v2263_v32 }
 0x77b   : > { %v2342_v49 = vpop.f32.mrf.mxu1 }
 0x77c   : > { %v2343_v37 = vadd.f32 %v2342_v49, %v2265_v47  ;;  %v3924_v29 = vpop.f32.mrf.mxu0 }
 0x77e   : > { %2556 = vmatprep.subr.mxu1 %v2343_v37  ;;  %v2486_v60 = vpop.f32.mrf.mxu0 }
 0x77f   : > { %2557 = vmatpush1.msra.mxu1 %v2341_v52 }
 0x780   : > { %2558 = vmatprep.subr.mxu1 %v2337_v58 }
 0x781   : > { %2559 = vmatpush1.msra.mxu1 %v2335_v63 }
 0x782   : > { %3421 = vmatmul.mubr.msk.f32.vlgmr.msra.gmra.mxu1 %vm2503_vm2, %v2495_v36 }
 0x783   : > { %2598 = vmatprep.mubr.f32.mxu1 %v4149_v54 }
 0x786   : > { %3422 = vmatmul.mubr.msk.f32.gmra.mxu1 %vm2503_vm2, %v2496_v1 }
 0x787   : > { %2604 = vmatprep.mubr.f32.mxu1 %v4149_v54 }
 0x78a   : > { %3423 = vmatmul.mubr.msk.f32.gmra.mxu1 %vm2503_vm2, %v2497_v4 }
 0x78b   : > { %2610 = vmatprep.mubr.f32.mxu1 %v4149_v54 }
 0x78e   : > { %3424 = vmatmul.mubr.msk.f32.gmra.mxu1 %vm2503_vm2, %v2498_v5 }
 0x78f   : > { %2616 = vmatprep.mubr.f32.mxu1 %v4149_v54 }
 0x791   : > { %v3628_v13 = vpop.f32.mrf.mxu1 }
 0x792   : > { %3425 = vmatmul.mubr.msk.f32.gmra.mxu1 %vm2503_vm2, %v2499_v11 }
 0x793   : > { %v3629_v17 = vpop.f32.mrf.mxu1  ;;  %2622 = vmatprep.mubr.f32.mxu1 %v4149_v54 }
 0x794   : > { %v3630_v41 = vadd.f32 %v3629_v17, %v3628_v13 }
 0x795   : > { %v3631_v15 = vpop.f32.mrf.mxu1 }
 0x796   : > { %3426 = vmatmul.mubr.msk.f32.gmra.mxu1 %vm2503_vm2, %v2500_v24  ;;  %v2487_v27 = vadd.f32 %v3630_v41, %v2486_v60 }
 0x797   : > { %v3632_v34 = vpop.f32.mrf.mxu1  ;;  %2628 = vmatprep.mubr.f32.mxu1 %v4149_v54 }
 0x798   : > { %v3633_v21 = vadd.f32 %v3632_v34, %v3631_v15 }
 0x79a   : > { %v2492_v42 = vadd.f32 %v3924_v29, %v3633_v21  ;;  %3427 = vmatmul.mubr.msk.f32.gmra.mxu1 %vm2503_vm2, %v2501_v22 }
 0x79b   : > { %2634 = vmatprep.mubr.f32.mxu1 %v4149_v54 }
 0x79c   : > { %3925 = vmatprep.subr.mxu0 %v2492_v42  ;;  %3941 = vmatprep.subr.mxu1 %v2492_v42 }
 0x79d   : > { %3926 = vmatpush3.msra.mxu0 %v2492_v42  ;;  %3943 = vmatpush3.msra.mxu1 %v2492_v42 }
 0x79e   : > { %3927 = vmatprep.subr.mxu0 %v2487_v27  ;;  %3942 = vmatprep.subr.mxu1 %v2487_v27 }
 0x79f   : > { %3928 = vmatpush3.msra.mxu0 %v2487_v27  ;;  %3944 = vmatpush3.msra.mxu1 %v2487_v27 }
 0x7a0   : > { %3930 = vmatmul.mubr.msk.f32.vlgmr.msra.gmra.mxu0 %vm2503_vm2, %v2496_v1  ;;  %3428 = vmatmul.mubr.msk.f32.gmra.mxu1 %vm2503_vm2, %v2502_v31 }
 0x7a1   : > { %3932 = vmatprep.mubr.msk.f32.mxu0 %vm2503_vm2, %v2497_v4  ;;  %3938 = vmatprep.mubr.msk.f32.mxu1 %vm2503_vm2, %v2501_v22 }
 0x7a4   : > { %3933 = vmatmul.mubr.msk.f32.gmra.mxu0 %vm2503_vm2, %v2498_v5  ;;  %3939 = vmatmul.mubr.msk.f32.vlgmr.msra.gmra.mxu1 %vm2503_vm2, %v2502_v31 }
 0x7a5   : > { %3935 = vmatprep.mubr.msk.f32.mxu0 %vm2503_vm2, %v2499_v11 }
 0x7a8   : > { %3936 = vmatmul.mubr.msk.f32.gmra.mxu0 %vm2503_vm2, %v2500_v24 }
 0x842   : > { %v2594_v54 = vpop.f32.mrf.mxu1 }
 0x844   : > { %v2596_v61 = vpop.f32.mrf.mxu1 }
 0x845   : > { %v2748_v19 = vadd.f32 %v2596_v61, %v2594_v54 }
 0x846   : > { %v2600_v28 = vpop.f32.mrf.mxu1 }
 0x848   : > { %v2602_v12 = vpop.f32.mrf.mxu1 }
 0x849   : > { %v2752_v33 = vadd.f32 %v2602_v12, %v2600_v28 }
 0x84a   : > { %v5627_v23 = vpop.f32.mrf.mxu1 }
 0x84c   : > { %v5629_v20 = vpop.f32.mrf.mxu1 }
 0x84d   : > { %v2756_v45 = vadd.f32 %v5629_v20, %v5627_v23 }
 0x84e   : > { %v2612_v25 = vpop.f32.mrf.mxu1 }
 0x850   : > { %v2614_v6 = vpop.f32.mrf.mxu1 }
 0x851   : > { %v2760_v14 = vadd.f32 %v2614_v6, %v2612_v25 }
 0x852   : > { %v5631_v16 = vpop.f32.mrf.mxu1 }
 0x854   : > { %v5633_v3 = vpop.f32.mrf.mxu1 }
 0x855   : > { %v2764_v46 = vadd.f32 %v5633_v3, %v5631_v16 }
 0x856   : > { %v5635_v62 = vpop.f32.mrf.mxu1 }
 0x858   : > { %v5637_v0 = vpop.f32.mrf.mxu1 }
 0x859   : > { %v2768_v32 = vadd.f32 %v5637_v0, %v5635_v62 }
 0x85a   : > { %v5639_v59 = vpop.f32.mrf.mxu1 }
 0x85c   : > { %v5641_v2 = vpop.f32.mrf.mxu1 }
 0x85d   : > { %v2772_v38 = vadd.f32 %v5641_v2, %v5639_v59 }
 0x860   : > { %v3931_v26 = vpop.f32.mrf.mxu0  ;;  %v5643_v53 = vpop.f32.mrf.mxu1 }
 0x861   : > { %v2753_v51 = vadd.f32 %v3931_v26, %v2752_v33 }
 0x862   : > { %v2707_v18 = vpop.f32.mrf.mxu0  ;;  %v5645_v9 = vpop.f32.mrf.mxu1 }
 0x863   : > { %2754 = vadd.xlane.f32.xlu1 %v2753_v51  ;;  %v2749_v10 = vadd.f32 %v2748_v19, %v2707_v18  ;;  %v2776_v30 = vadd.f32 %v5645_v9, %v5643_v53 }
 0x864   : > { %v3934_v50 = vpop.f32.mrf.mxu0  ;;  %v5649_v39 = vpop.f32.mrf.mxu1 }
 0x865   : > { %2750 = vadd.xlane.f32.xlu0 %v2749_v10  ;;  %v2761_v8 = vadd.f32 %v3934_v50, %v2760_v14  ;;  %v2777_v37 = vadd.f32 %v5649_v39, %v2776_v30 }
 0x866   : > { %v2717_v48 = vpop.f32.mrf.mxu0  ;;  %v5657_v44 = vpop.f32.mrf.mxu1 }
 0x867   : > { %v2757_v35 = vadd.f32 %v2756_v45, %v2717_v48  ;;  %v2773_v47 = vadd.f32 %v2772_v38, %v5657_v44 }
 0x868   : > { %v5647_v43 = vpop.f32.mrf.mxu0 }
 0x869   : > { %2762 = vadd.xlane.f32.xlu0 %v2761_v8  ;;  %v2769_v49 = vadd.f32 %v5647_v43, %v2768_v32 }
 0x86a   : > { %v2727_v36 = vpop.f32.mrf.mxu0 }
 0x86b   : > { %v2765_v40 = vadd.f32 %v2764_v46, %v2727_v36 }
 0x86d   : > { %2758 = vadd.xlane.f32.xlu0 %v2757_v35  ;;  %2766 = vadd.xlane.f32.xlu1 %v2765_v40 }
 0x871   : > { %2770 = vadd.xlane.f32.xlu0 %v2769_v49  ;;  %2774 = vadd.xlane.f32.xlu1 %v2773_v47 }
 0x875   : > { %2778 = vadd.xlane.f32.xlu0 %v2777_v37 }
 0x8ec   : > { %v2755_v52 = vpop.xlane.xlu1 %2754 }
 0x8ed   : > { %v2781_v58 = vmul.f32 0.0026041667, %v2755_v52 }
 0x8ee   : > { %v2751_v63 = vpop.xlane.xlu0 %2750 }
 0x8ef   : > { %v5666_v1 = vsub.f32 %v2600_v28, %v2781_v58  ;;  %v5668_v4 = vsub.f32 %v2602_v12, %v2781_v58  ;;  %v2780_v5 = vmul.f32 0.0026041667, %v2751_v63  ;;  %v5670_v11 = vsub.f32 %v3931_v26, %v2781_v58 }
 0x8f1   : > { %v5672_v13 = vsub.f32 %v2594_v54, %v2780_v5  ;;  %v5674_v17 = vsub.f32 %v2596_v61, %v2780_v5  ;;  %v5676_v24 = vsub.f32 %v2707_v18, %v2780_v5  ;;  %v2815_v15 = vmul.f32 %v5666_v1, %v5666_v1 }
 0x8f2   : > { %v2763_v29 = vpop.xlane.xlu0 %2762  ;;  %v2816_v34 = vmul.f32 %v5668_v4, %v5668_v4  ;;  %v2817_v42 = vmul.f32 %v5670_v11, %v5670_v11 }
 0x8f3   : > { %v2812_v22 = vmul.f32 %v5672_v13, %v5672_v13  ;;  %v2813_v41 = vmul.f32 %v5674_v17, %v5674_v17  ;;  %v2783_v21 = vmul.f32 0.0026041667, %v2763_v29  ;;  %v2814_v54 = vmul.f32 %v5676_v24, %v5676_v24 }
 0x8f4   : > { %v2840_v60 = vadd.f32 %v2816_v34, %v2815_v15 }
 0x8f5   : > { %v5688_v27 = vsub.f32 %v2612_v25, %v2783_v21  ;;  %v5690_v31 = vsub.f32 %v2614_v6, %v2783_v21  ;;  %v2836_v61 = vadd.f32 %v2813_v41, %v2812_v22  ;;  %v5694_v28 = vsub.f32 %v3934_v50, %v2783_v21 }
 0x8f6   : > { %v2759_v12 = vpop.xlane.xlu0 %2758  ;;  %v2767_v33 = vpop.xlane.xlu1 %2766  ;;  %v2841_v26 = vadd.f32 %v2840_v60, %v2817_v42 }
 0x8f7   : > { %v2782_v19 = vmul.f32 0.0026041667, %v2759_v12  ;;  %v2784_v51 = vmul.f32 0.0026041667, %v2767_v33  ;;  %v2837_v18 = vadd.f32 %v2836_v61, %v2814_v54  ;;  %v2821_v10 = vmul.f32 %v5688_v27, %v5688_v27 }
 0x8f8   : > { %2842 = vadd.xlane.f32.xlu0 %v2841_v26  ;;  %v2822_v25 = vmul.f32 %v5690_v31, %v5690_v31 }
 0x8f9   : > { %v5701_v6 = vsub.f32 %v5627_v23, %v2782_v19  ;;  %v5704_v14 = vsub.f32 %v5629_v20, %v2782_v19  ;;  %v5706_v50 = vsub.f32 %v2717_v48, %v2782_v19  ;;  %v5709_v8 = vsub.f32 %v5631_v16, %v2784_v51  ;;  %2838 = vadd.xlane.f32.xlu1 %v2837_v18 }
 0x8fa   : > { %v5712_v45 = vsub.f32 %v5633_v3, %v2784_v51  ;;  %v5714_v46 = vsub.f32 %v2727_v36, %v2784_v51  ;;  %v2771_v38 = vpop.xlane.xlu0 %2770  ;;  %v2775_v40 = vpop.xlane.xlu1 %2774  ;;  %v2823_v23 = vmul.f32 %v5694_v28, %v5694_v28  ;;  %v2848_v35 = vadd.f32 %v2822_v25, %v2821_v10 }
 0x8fb   : > { %v2818_v20 = vmul.f32 %v5701_v6, %v5701_v6  ;;  %v2819_v48 = vmul.f32 %v5704_v14, %v5704_v14  ;;  %v2824_v16 = vmul.f32 %v5709_v8, %v5709_v8  ;;  %v2785_v32 = vmul.f32 0.0026041667, %v2771_v38 }
 0x8fc   : > { %v2825_v3 = vmul.f32 %v5712_v45, %v5712_v45  ;;  %v2786_v36 = vmul.f32 0.0026041667, %v2775_v40  ;;  %v2849_v30 = vadd.f32 %v2848_v35, %v2823_v23  ;;  %v2820_v47 = vmul.f32 %v5706_v50, %v5706_v50 }
 0x8fd   : > { %v5729_v49 = vsub.f32 %v5635_v62, %v2785_v32  ;;  %v5732_v37 = vsub.f32 %v5637_v0, %v2785_v32  ;;  %v5735_v52 = vsub.f32 %v5647_v43, %v2785_v32  ;;  %v2844_v58 = vadd.f32 %v2819_v48, %v2818_v20 }
 0x8fe   : > { %v5738_v63 = vsub.f32 %v5639_v59, %v2786_v36  ;;  %v5741_v5 = vsub.f32 %v5641_v2, %v2786_v36  ;;  %v5744_v15 = vsub.f32 %v5657_v44, %v2786_v36  ;;  %2850 = vadd.xlane.f32.xlu0 %v2849_v30  ;;  %v2779_v29 = vpop.xlane.xlu0 %2778  ;;  %v2826_v62 = vmul.f32 %v5714_v46, %v5714_v46  ;;  %v2746_v36 = vld [vmem:[%s6079_s7] sm:$0x7] }
 0x8ff   : > { %v2787_v0 = vmul.f32 0.0026041667, %v2779_v29  ;;  %v2845_v34 = vadd.f32 %v2844_v58, %v2820_v47  ;;  %v2827_v43 = vmul.f32 %v5729_v49, %v5729_v49  ;;  %v2828_v59 = vmul.f32 %v5732_v37, %v5732_v37  ;;  %v2747_v47 = vld [vmem:[%s6080_s8] sm:$0x7] }
 0x900   : > { %v2830_v2 = vmul.f32 %v5738_v63, %v5738_v63  ;;  %v2831_v44 = vmul.f32 %v5741_v5, %v5741_v5  ;;  %v2829_v22 = vmul.f32 %v5735_v52, %v5735_v52  ;;  %v2852_v41 = vadd.f32 %v2825_v3, %v2824_v16 }
 0x901   : > { %v5759_v21 = vsub.f32 %v5643_v53, %v2787_v0  ;;  %v5762_v42 = vsub.f32 %v5645_v9, %v2787_v0  ;;  %v5765_v60 = vsub.f32 %v5649_v39, %v2787_v0  ;;  %2846 = vadd.xlane.f32.xlu1 %v2845_v34  ;;  %v2856_v54 = vadd.f32 %v2828_v59, %v2827_v43 }
 0x902   : > { %v2853_v61 = vadd.f32 %v2852_v41, %v2826_v62  ;;  %v2860_v19 = vadd.f32 %v2831_v44, %v2830_v2  ;;  %v2832_v39 = vmul.f32 %v5744_v15, %v5744_v15  ;;  %v2996_v62 = vld [vmem:[%s6081_s9] sm:$0x7]  ;;  %v5785_v43 = vrot.slane %v2746_v36, %v4562_v56 }
 0x903   : > { %v2857_v12 = vadd.f32 %v2856_v54, %v2829_v22  ;;  %v2833_v33 = vmul.f32 %v5759_v21, %v5759_v21  ;;  %v2834_v26 = vmul.f32 %v5762_v42, %v5762_v42  ;;  %v2835_v53 = vmul.f32 %v5765_v60, %v5765_v60 }
 0x904   : > { %v2861_v18 = vadd.f32 %v2860_v19, %v2832_v39  ;;  %v5788_v59 = vrot.slane %v2747_v47, %v4562_v56  ;;  %v5791_v2 = vrot.slane %v2746_v36, %v4565_v57  ;;  %v5794_v41 = vrot.slane %v2747_v47, %v4565_v57 }
 0x905   : > { %2858 = vadd.xlane.f32.xlu0 %v2857_v12  ;;  %2854 = vadd.xlane.f32.xlu1 %v2853_v61  ;;  %v2864_v9 = vadd.f32 %v2834_v26, %v2833_v33  ;;  %v5797_v54 = vrot.slane %v2996_v62, %v4565_v57  ;;  %v5800_v61 = vrot.slane %v2746_v36, %v4578_v7 }
 0x906   : > { %v5803_v12 = vrot.slane %v2747_v47, %v4578_v7 }
 0x907   : > { %v2865_v51 = vadd.f32 %v2864_v9, %v2835_v53  ;;  %v5806_v53 = vrot.slane %v2996_v62, %v4578_v7 }
 0x909   : > { %2866 = vadd.xlane.f32.xlu0 %v2865_v51  ;;  %2862 = vadd.xlane.f32.xlu1 %v2861_v18 }
 0x981   : > { %v2843_v10 = vpop.xlane.xlu0 %2842 }
 0x982   : > { %v2869_v25 = vmul.f32 0.0026041667, %v2843_v10  ;;  %v2839_v38 = vpop.xlane.xlu1 %2838 }
 0x983   : > { %v2868_v40 = vmul.f32 0.0026041667, %v2839_v38 }
 0x984   : > { %v2877_v23 = vadd.f32 1e-05, %v2869_v25 }
 0x985   : > { %v2876_v35 = vadd.f32 1e-05, %v2868_v40 }
 0x986   : > { %4062 = vrsqrt.f32 %v2877_v23 }
 0x987   : > { %4064 = vrsqrt.f32 %v2876_v35  ;;  %v2851_v20 = vpop.xlane.xlu0 %2850 }
 0x988   : > { %v2871_v48 = vmul.f32 0.0026041667, %v2851_v20 }
 0x98a   : > { %v2879_v16 = vadd.f32 1e-05, %v2871_v48  ;;  %v2847_v32 = vpop.xlane.xlu1 %2846 }
 0x98b   : > { %v2870_v3 = vmul.f32 0.0026041667, %v2847_v32 }
 0x98c   : > { %4066 = vrsqrt.f32 %v2879_v16 }
 0x98d   : > { %v2878_v30 = vadd.f32 1e-05, %v2870_v3 }
 0x98e   : > { %v2859_v58 = vpop.xlane.xlu0 %2858  ;;  %v2855_v29 = vpop.xlane.xlu1 %2854 }
 0x98f   : > { %4068 = vrsqrt.f32 %v2878_v30  ;;  %v2873_v0 = vmul.f32 0.0026041667, %v2859_v58  ;;  %v2872_v34 = vmul.f32 0.0026041667, %v2855_v29 }
 0x991   : > { %v2881_v44 = vadd.f32 1e-05, %v2873_v0  ;;  %v2880_v22 = vadd.f32 1e-05, %v2872_v34 }
 0x992   : > { %v2867_v33 = vpop.xlane.xlu0 %2866  ;;  %v2863_v26 = vpop.xlane.xlu1 %2862 }
 0x993   : > { %v4063_v19 = vpop.eup %4062  ;;  %4070 = vrsqrt.f32 %v2881_v44  ;;  %v2875_v9 = vmul.f32 0.0026041667, %v2867_v33  ;;  %v2874_v39 = vmul.f32 0.0026041667, %v2863_v26 }
 0x994   : > { %v4065_v51 = vpop.eup %4064  ;;  %4072 = vrsqrt.f32 %v2880_v22  ;;  %v2895_v57 = vmul.f32 %v4063_v19, %v5666_v1  ;;  %v2896_v18 = vmul.f32 %v4063_v19, %v5668_v4  ;;  %v2897_v10 = vmul.f32 %v4063_v19, %v5670_v11 }
 0x995   : > { %v2883_v25 = vadd.f32 1e-05, %v2875_v9  ;;  %v2882_v38 = vadd.f32 1e-05, %v2874_v39  ;;  %v2892_v40 = vmul.f32 %v4065_v51, %v5672_v13  ;;  %v2893_v23 = vmul.f32 %v4065_v51, %v5674_v17 }
 0x996   : > { %v2935_v7 = vmul.f32 %v5791_v2, %v2895_v57  ;;  %v2936_v35 = vmul.f32 %v5800_v61, %v2896_v18  ;;  %v2937_v20 = vmul.f32 %v5785_v43, %v2897_v10  ;;  %v2894_v48 = vmul.f32 %v4065_v51, %v5676_v24 }
 0x997   : > { %4074 = vrsqrt.f32 %v2883_v25  ;;  %v2932_v1 = vmul.f32 %v5791_v2, %v2892_v40  ;;  %v2933_v4 = vmul.f32 %v5800_v61, %v2893_v23  ;;  %v5820_v11 = vrot.slane %v2996_v62, %v4562_v56 }
 0x998   : > { %v5823_v13 = vadd.f32 %v5794_v41, %v2935_v7  ;;  %v5826_v17 = vadd.f32 %v5803_v12, %v2936_v35  ;;  %v5829_v16 = vadd.f32 %v5788_v59, %v2937_v20  ;;  %v2934_v24 = vmul.f32 %v5785_v43, %v2894_v48 }
 0x999   : > { %v4067_v32 = vpop.eup %4066  ;;  %v5833_v3 = vadd.f32 %v5794_v41, %v2932_v1  ;;  %v5836_v36 = vadd.f32 %v5803_v12, %v2933_v4  ;;  %4076 = vrsqrt.f32 %v2882_v38 }
 0x99a   : > { %v3016_v56 = vmul.f32 %v5797_v54, %v5823_v13  ;;  %v3017_v30 = vmul.f32 %v5806_v53, %v5826_v17  ;;  %v2901_v47 = vmul.f32 %v4067_v32, %v5688_v27  ;;  %v5844_v58 = vadd.f32 %v5788_v59, %v2934_v24 }
 0x99b   : > { %v3013_v29 = vmul.f32 %v5797_v54, %v5833_v3  ;;  %v3014_v62 = vmul.f32 %v5806_v53, %v5836_v36  ;;  %v2902_v0 = vmul.f32 %v4067_v32, %v5690_v31  ;;  %v3018_v44 = vmul.f32 %v5820_v11, %v5829_v16 }
 0x99c   : > { %v4069_v34 = vpop.eup %4068  ;;  %v3041_v22 = vadd.f32 %v3017_v30, %v3016_v56  ;;  %v2903_v33 = vmul.f32 %v4067_v32, %v5694_v28  ;;  %v2941_v27 = vmul.f32 %v5791_v2, %v2901_v47  ;;  %v3015_v26 = vmul.f32 %v5820_v11, %v5844_v58 }
 0x99d   : > { %v3037_v19 = vadd.f32 %v3014_v62, %v3013_v29  ;;  %v2942_v9 = vmul.f32 %v5800_v61, %v2902_v0  ;;  %v2898_v39 = vmul.f32 %v4069_v34, %v5701_v6  ;;  %v2899_v18 = vmul.f32 %v4069_v34, %v5704_v14 }
 0x99e   : > { %v3042_v51 = vadd.f32 %v3041_v22, %v3018_v44  ;;  %v2943_v31 = vmul.f32 %v5785_v43, %v2903_v33  ;;  %v5861_v57 = vadd.f32 %v5794_v41, %v2941_v27  ;;  %v2900_v25 = vmul.f32 %v4069_v34, %v5706_v50 }
 0x99f   : > { %v3038_v10 = vadd.f32 %v3037_v19, %v3015_v26  ;;  %v5865_v28 = vadd.f32 %v5803_v12, %v2942_v9  ;;  %v2938_v38 = vmul.f32 %v5791_v2, %v2898_v39  ;;  %v2939_v7 = vmul.f32 %v5800_v61, %v2899_v18 }
 0x9a0   : > { %v4071_v40 = vpop.eup %4070  ;;  %3043 = vadd.xlane.f32.xlu0 %v3042_v51  ;;  %v5870_v6 = vadd.f32 %v5788_v59, %v2943_v31  ;;  %v3022_v23 = vmul.f32 %v5797_v54, %v5861_v57  ;;  %v2940_v20 = vmul.f32 %v5785_v43, %v2900_v25 }
 0x9a1   : > { %v4073_v35 = vpop.eup %4072  ;;  %3039 = vadd.xlane.f32.xlu1 %v3038_v10  ;;  %v3023_v14 = vmul.f32 %v5806_v53, %v5865_v28  ;;  %v5879_v50 = vadd.f32 %v5794_v41, %v2938_v38  ;;  %v2907_v48 = vmul.f32 %v4071_v40, %v5729_v49  ;;  %v5885_v4 = vadd.f32 %v5803_v12, %v2939_v7 }
 0x9a2   : > { %v3024_v1 = vmul.f32 %v5820_v11, %v5870_v6  ;;  %v2908_v32 = vmul.f32 %v4071_v40, %v5732_v37  ;;  %v2909_v24 = vmul.f32 %v4071_v40, %v5735_v52  ;;  %v5890_v30 = vadd.f32 %v5788_v59, %v2940_v20 }
 0x9a3   : > { %v3049_v56 = vadd.f32 %v3023_v14, %v3022_v23  ;;  %v3019_v47 = vmul.f32 %v5797_v54, %v5879_v50  ;;  %v2947_v29 = vmul.f32 %v5791_v2, %v2907_v48  ;;  %v3020_v62 = vmul.f32 %v5806_v53, %v5885_v4 }
 0x9a4   : > { %v4075_v49 = vpop.eup %4074  ;;  %v2948_v0 = vmul.f32 %v5800_v61, %v2908_v32  ;;  %v2949_v34 = vmul.f32 %v5785_v43, %v2909_v24  ;;  %v2904_v37 = vmul.f32 %v4073_v35, %v5709_v8  ;;  %v3021_v44 = vmul.f32 %v5820_v11, %v5890_v30 }
 0x9a5   : > { %v3050_v52 = vadd.f32 %v3049_v56, %v3024_v1  ;;  %v5903_v22 = vadd.f32 %v5794_v41, %v2947_v29  ;;  %v2905_v33 = vmul.f32 %v4073_v35, %v5712_v45  ;;  %v3045_v27 = vadd.f32 %v3020_v62, %v3019_v47 }
 0x9a6   : > { %v5907_v26 = vadd.f32 %v5803_v12, %v2948_v0  ;;  %v5910_v19 = vadd.f32 %v5788_v59, %v2949_v34  ;;  %v2906_v9 = vmul.f32 %v4073_v35, %v5714_v46  ;;  %v4077_v39 = vpop.eup %4076  ;;  %v2944_v51 = vmul.f32 %v5791_v2, %v2904_v37 }
 0x9a7   : > { %3051 = vadd.xlane.f32.xlu0 %v3050_v52  ;;  %v3028_v8 = vmul.f32 %v5797_v54, %v5903_v22  ;;  %v2945_v31 = vmul.f32 %v5800_v61, %v2905_v33  ;;  %v2913_v45 = vmul.f32 %v4075_v49, %v5759_v21  ;;  %v3046_v18 = vadd.f32 %v3045_v27, %v3021_v44 }
 0x9a8   : > { %v3029_v10 = vmul.f32 %v5806_v53, %v5907_v26  ;;  %v3030_v25 = vmul.f32 %v5820_v11, %v5910_v19  ;;  %v2946_v46 = vmul.f32 %v5785_v43, %v2906_v9  ;;  %v5924_v38 = vadd.f32 %v5794_v41, %v2944_v51 }
 0x9a9   : > { %v5927_v40 = vadd.f32 %v5803_v12, %v2945_v31  ;;  %v2914_v23 = vmul.f32 %v4075_v49, %v5762_v42  ;;  %v2915_v7 = vmul.f32 %v4075_v49, %v5765_v60  ;;  %3047 = vadd.xlane.f32.xlu1 %v3046_v18  ;;  %v2953_v14 = vmul.f32 %v5791_v2, %v2913_v45 }
 0x9aa   : > { %v3057_v21 = vadd.f32 %v3029_v10, %v3028_v8  ;;  %v5932_v35 = vadd.f32 %v5788_v59, %v2946_v46  ;;  %v2910_v20 = vmul.f32 %v4077_v39, %v5738_v63  ;;  %v3025_v48 = vmul.f32 %v5797_v54, %v5924_v38 }
 0x9ab   : > { %v3026_v1 = vmul.f32 %v5806_v53, %v5927_v40  ;;  %v2954_v32 = vmul.f32 %v5800_v61, %v2914_v23  ;;  %v2955_v42 = vmul.f32 %v5785_v43, %v2915_v7  ;;  %v5945_v56 = vadd.f32 %v5794_v41, %v2953_v14 }
 0x9ac   : > { %v3058_v60 = vadd.f32 %v3057_v21, %v3030_v25  ;;  %v3027_v24 = vmul.f32 %v5820_v11, %v5932_v35  ;;  %v2911_v47 = vmul.f32 %v4077_v39, %v5741_v5  ;;  %v2912_v62 = vmul.f32 %v4077_v39, %v5744_v15 }
 0x9ad   : > { %v3053_v63 = vadd.f32 %v3026_v1, %v3025_v48  ;;  %v5949_v29 = vadd.f32 %v5803_v12, %v2954_v32  ;;  %v5952_v49 = vadd.f32 %v5788_v59, %v2955_v42  ;;  %v3034_v0 = vmul.f32 %v5797_v54, %v5945_v56 }
 0x9ae   : > { %3059 = vadd.xlane.f32.xlu0 %v3058_v60  ;;  %v2950_v34 = vmul.f32 %v5791_v2, %v2910_v20  ;;  %v2951_v37 = vmul.f32 %v5800_v61, %v2911_v47  ;;  %v2952_v44 = vmul.f32 %v5785_v43, %v2912_v62  ;;  %v6087_v45 = vlaneseq }
 0x9af   : > { %v3054_v52 = vadd.f32 %v3053_v63, %v3027_v24  ;;  %v3035_v5 = vmul.f32 %v5806_v53, %v5949_v29  ;;  %v3036_v15 = vmul.f32 %v5820_v11, %v5952_v49 }
 0x9b0   : > { %v5963_v33 = vadd.f32 %v5794_v41, %v2950_v34  ;;  %v5966_v27 = vadd.f32 %v5803_v12, %v2951_v37  ;;  %v5971_v2 = vadd.f32 %v5788_v59, %v2952_v44  ;;  %v3078_v18 = vand.u32 127, %v6087_v45 }
 0x9b1   : > { %3055 = vadd.xlane.f32.xlu1 %v3054_v52  ;;  %v3065_v9 = vadd.f32 %v3035_v5, %v3034_v0  ;;  %v4150_v45 = vmov 0  }
 0x9b2   : > { %v3031_v61 = vmul.f32 %v5797_v54, %v5963_v33  ;;  %v3032_v43 = vmul.f32 %v5806_v53, %v5966_v27  ;;  %v3033_v41 = vmul.f32 %v5820_v11, %v5971_v2  ;;  %v3083_v25 = vadd.s32 4294967288, %v3078_v18  ;;  %4004 = vset.pattern.permute.xlu0 %v4150_v45 }
 0x9b3   : > { %v3066_v39 = vadd.f32 %v3065_v9, %v3036_v15  ;;  %v3081_v54 = vsub.s32 %v3078_v18, %v4559_v55 }
 0x9b4   : > { %v3061_v12 = vadd.f32 %v3032_v43, %v3031_v61  ;;  %v3086_v53 = vsub.s32 %v3083_v25, %v4559_v55 }
 0x9b5   : > { %3067 = vadd.xlane.f32.xlu0 %v3066_v39 }
 0x9b6   : > { %v3062_v8 = vadd.f32 %v3061_v12, %v3033_v41 }
 0x9b8   : > { %3063 = vadd.xlane.f32.xlu1 %v3062_v8 }
 0xa29   : > { %v3044_v51 = vpop.xlane.xlu0 %3043 }
 0xa2a   : > { %v3040_v31 = vpop.xlane.xlu1 %3039  ;;  %v3087_v1 = vrot.slane %v3044_v51, %v3086_v53 }
 0xa2b   : > { %v3082_v14 = vrot.slane %v3040_v31, %v3081_v54 }
 0xa2d   : > { %v3089_v47 = vsel %vm3088_vm3, %v3087_v1, %v3082_v14 }
 0xa30   : > { %v3052_v59 = vpop.xlane.xlu0 %3051 }
 0xa31   : > { %v3097_v20 = vrot.slane %v3052_v59, %v3086_v53 }
 0xa32   : > { %v3048_v10 = vpop.xlane.xlu1 %3047 }
 0xa33   : > { %v3093_v7 = vrot.slane %v3048_v10, %v3081_v54 }
 0xa35   : > { %v3098_v32 = vsel %vm3088_vm3, %v3097_v20, %v3093_v7  ;;  %v4153_v7 = vmov 2  }
 0xa36   : > { %v3118_v62 = vsel %vm3117_vm4, %v3098_v32, %v3089_v47 }
 0xa37   : > { %v3060_v46 = vpop.xlane.xlu0 %3059 }
 0xa38   : > { %v3106_v21 = vrot.slane %v3060_v46, %v3086_v53 }
 0xa3a   : > { %v3056_v23 = vpop.xlane.xlu1 %3055 }
 0xa3b   : > { %v3102_v11 = vrot.slane %v3056_v23, %v3081_v54  ;;  %v4151_v23 = vmov 1  }
 0xa3d   : > { %v3107_v60 = vsel %vm3088_vm3, %v3106_v21, %v3102_v11 }
 0xa3e   : > { %v3068_v48 = vpop.xlane.xlu0 %3067  ;;  %v3120_v55 = vsel %vm3119_vm5, %v3107_v60, %v3118_v62 }
 0xa3f   : > { %v3115_v42 = vrot.slane %v3068_v48, %v3086_v53  ;;  %v4152_v53 = vmov 3  }
 0xa41   : > { %v3064_v24 = vpop.xlane.xlu1 %3063 }
 0xa42   : > { %v3111_v63 = vrot.slane %v3064_v24, %v3081_v54 }
 0xa44   : > { %v3116_v0 = vsel %vm3088_vm3, %v3115_v42, %v3111_v63 }
 0xa45   : > { %v3122_v34 = vsel %vm3121_vm6, %v3116_v0, %v3120_v55 }
 0xa46   : > { %3124 = vxpose.xlu1.b32.start.end [1/1] (short) (narrow) %v3122_v34, 16 }
 0xa64   : > { %4007 = vset.pattern.permute.xlu1 %v4150_v45 }
 0xac2   : > { %v3140_v37 = vpop.trf.xlu1 }
 0xac3   : > { %v3157_v52 = vsel %vm3156_vm7, %v3140_v37, -inf }
 0xac4   : > { %3158 = vmax.xlane.f32.xlu0 %v3157_v52 }
 0xac6   : > { %v3141_v5 = vpop.trf.xlu1 }
 0xac7   : > { %v3160_v44 = vsel %vm3156_vm7, %v3141_v5, -inf }
 0xac8   : > { %3161 = vmax.xlane.f32.xlu0 %v3160_v44 }
 0xb4d   : > { %v3159_v15 = vpop.xlane.xlu0 %3158 }
 0xb4e   : > { %v3163_v9 = vsub.f32 %v3140_v37, %v3159_v15 }
 0xb50   : > { %v3165_v61 = vmul.f32 1.442695, %v3163_v9 }
 0xb51   : > { %v3162_v43 = vpop.xlane.xlu0 %3161 }
 0xb52   : > { %4078 = vpow2.f32 %v3165_v61  ;;  %v3164_v39 = vsub.f32 %v3141_v5, %v3162_v43 }
 0xb54   : > { %v3167_v41 = vmul.f32 1.442695, %v3164_v39 }
 0xb56   : > { %4080 = vpow2.f32 %v3167_v41 }
 0xb5f   : > { %v4079_v12 = vpop.eup %4078 }
 0xb60   : > { %v3169_v8 = vsel %vm3156_vm7, %v4079_v12, 0.0 }
 0xb61   : > { %3170 = vadd.xlane.f32.xlu0 %v3169_v8 }
 0xb63   : > { %v4081_v51 = vpop.eup %4080 }
 0xb64   : > { %v3172_v31 = vsel %vm3156_vm7, %v4081_v51, 0.0 }
 0xb65   : > { %3173 = vadd.xlane.f32.xlu0 %v3172_v31 }
 0xbea   : > { %v3171_v18 = vpop.xlane.xlu0 %3170 }
 0xbeb   : > { %4082 = vrcp.f32 %v3171_v18 }
 0xbee   : > { %v3174_v59 = vpop.xlane.xlu0 %3173 }
 0xbef   : > { %4084 = vrcp.f32 %v3174_v59 }
 0xbf8   : > { %v4083_v10 = vpop.eup %4082 }
 0xbf9   : > { %v3177_v25 = vmul.f32 %v4083_v10, %v4079_v12 }
 0xbfb   : > { %3181 = vperm.xlu0 %4004, %v3177_v25  }
 0xbfc   : > { %v4085_v46 = vpop.eup %4084 }
 0xbfd   : > { %v3178_v54 = vmul.f32 %v4085_v46, %v4081_v51 }
 0xbff   : > { %4005 = vset.pattern.permute.xlu0 %v4151_v23  ;;  %3186 = vperm.xlu1 %4007, %v3178_v54  }
 0xc00   : > { %3196 = vperm.xlu0 %4005, %v3177_v25  }
 0xc03   : > { %4010 = vset.pattern.permute.xlu1 %v4152_v53 }
 0xc04   : > { %4006 = vset.pattern.permute.xlu0 %v4153_v7  ;;  %3236 = vperm.xlu1 %4010, %v3177_v25  }
 0xc05   : > { %3216 = vperm.xlu0 %4006, %v3177_v25  }
 0xc09   : > { %4008 = vset.pattern.permute.xlu0 %v4151_v23 }
 0xc0a   : > { %3200 = vperm.xlu0 %4008, %v3178_v54  }
 0xc0e   : > { %4009 = vset.pattern.permute.xlu0 %v4153_v7 }
 0xc0f   : > { %3220 = vperm.xlu0 %4009, %v3178_v54  }
 0xc13   : > { %4011 = vset.pattern.permute.xlu0 %v4152_v53 }
 0xc14   : > { %3240 = vperm.xlu0 %4011, %v3178_v54  }
 0xc76   : > { %v3182_v21 = vpop.permute.xlu0 %3181 }
 0xc77   : > { %v3189_v32 = vmul.f32 %v3182_v21, %v5833_v3  ;;  %v3190_v42 = vmul.f32 %v3182_v21, %v5836_v36  ;;  %v3191_v60 = vmul.f32 %v3182_v21, %v5844_v58 }
 0xc7a   : > { %v3187_v11 = vpop.permute.xlu1 %3186 }
 0xc7b   : > { %v3197_v14 = vpop.permute.xlu0 %3196  ;;  %v3192_v61 = vmul.f32 %v3187_v11, %v5823_v13  ;;  %v3193_v43 = vmul.f32 %v3187_v11, %v5826_v17  ;;  %v3194_v12 = vmul.f32 %v3187_v11, %v5829_v16 }
 0xc7c   : > { %v3203_v20 = vmul.f32 %v3197_v14, %v5879_v50  ;;  %v3204_v48 = vmul.f32 %v3197_v14, %v5885_v4  ;;  %v3205_v1 = vmul.f32 %v3197_v14, %v5890_v30 }
 0xc7e   : > { %v3209_v47 = vadd.f32 %v3203_v20, %v3189_v32  ;;  %v3210_v63 = vadd.f32 %v3204_v48, %v3190_v42  ;;  %v3211_v0 = vadd.f32 %v3205_v1, %v3191_v60 }
 0xc7f   : > { %v3237_v24 = vpop.permute.xlu1 %3236 }
 0xc80   : > { %v3217_v62 = vpop.permute.xlu0 %3216  ;;  %v3243_v30 = vmul.f32 %v3237_v24, %v5963_v33  ;;  %v3244_v3 = vmul.f32 %v3237_v24, %v5966_v27  ;;  %v3245_v36 = vmul.f32 %v3237_v24, %v5971_v2 }
 0xc81   : > { %v3223_v55 = vmul.f32 %v3217_v62, %v5924_v38  ;;  %v3224_v50 = vmul.f32 %v3217_v62, %v5927_v40  ;;  %v3225_v4 = vmul.f32 %v3217_v62, %v5932_v35 }
 0xc83   : > { %v3229_v58 = vadd.f32 %v3223_v55, %v3209_v47  ;;  %v3230_v34 = vadd.f32 %v3224_v50, %v3210_v63  ;;  %v3231_v37 = vadd.f32 %v3225_v4, %v3211_v0 }
 0xc85   : > { %v3249_v52 = vadd.f32 %v3243_v30, %v3229_v58  ;;  %v3250_v5 = vadd.f32 %v3244_v3, %v3230_v34  ;;  %v3251_v44 = vadd.f32 %v3245_v36, %v3231_v37  ;;  %v3201_v15 = vpop.permute.xlu0 %3200 }
 0xc86   : > { %v3206_v35 = vmul.f32 %v3201_v15, %v5861_v57  ;;  %v3207_v33 = vmul.f32 %v3201_v15, %v5865_v28  ;;  %v3208_v27 = vmul.f32 %v3201_v15, %v5870_v6 }
 0xc87   : > { %v3255_v38 = vmul.f32 0.05103104, %v3249_v52  ;;  %v3256_v9 = vmul.f32 0.05103104, %v3250_v5  ;;  %v3257_v40 = vmul.f32 0.05103104, %v3251_v44 }
 0xc88   : > { %v3212_v57 = vadd.f32 %v3206_v35, %v3192_v61  ;;  %v3213_v51 = vadd.f32 %v3207_v33, %v3193_v43  ;;  %v3214_v28 = vadd.f32 %v3208_v27, %v3194_v12 }
 0xc89   : > { %3261 = vst [vmem:[%s6001_s28] sm:$0xff] %v3255_v38  ;;  %3262 = vst [vmem:[%s6001_s28 + $0x8] sm:$0xff] %v3256_v9 }
 0xc8a   : > { %3263 = vst [vmem:[%s6001_s28 + $0x10] sm:$0xff] %v3257_v40  ;;  %v3221_v2 = vpop.permute.xlu0 %3220 }
 0xc8b   : > { %v3226_v39 = vmul.f32 %v3221_v2, %v5903_v22  ;;  %v3227_v41 = vmul.f32 %v3221_v2, %v5907_v26  ;;  %v3228_v8 = vmul.f32 %v3221_v2, %v5910_v19 }
 0xc8d   : > { %v3232_v31 = vadd.f32 %v3226_v39, %v3212_v57  ;;  %v3233_v6 = vadd.f32 %v3227_v41, %v3213_v51  ;;  %v3234_v13 = vadd.f32 %v3228_v8, %v3214_v28 }
 0xc8f   : > { %v3241_v45 = vpop.permute.xlu0 %3240 }
 0xc90   : > { %v3246_v17 = vmul.f32 %v3241_v45, %v5945_v56  ;;  %v3247_v22 = vmul.f32 %v3241_v45, %v5949_v29  ;;  %v3248_v26 = vmul.f32 %v3241_v45, %v5952_v49 }
 0xc92   : > { %v3252_v16 = vadd.f32 %v3246_v17, %v3232_v31  ;;  %v3253_v19 = vadd.f32 %v3247_v22, %v3233_v6  ;;  %v3254_v18 = vadd.f32 %v3248_v26, %v3234_v13 }
 0xc94   : > { %v3258_v59 = vmul.f32 0.05103104, %v3252_v16  ;;  %v3259_v10 = vmul.f32 0.05103104, %v3253_v19  ;;  %v3260_v25 = vmul.f32 0.05103104, %v3254_v18 }
 0xc96   : > { %3264 = vst [vmem:[%s6001_s28 + $0x18] sm:$0xff] %v3258_v59  ;;  %3265 = vst [vmem:[%s6001_s28 + $0x20] sm:$0xff] %v3259_v10 }
 0xc97   : > { %3266 = vst [vmem:[%s6001_s28 + $0x28] sm:$0xff] %v3260_v25 }
 0xc98   : > { %4099 = shalt.err (!%p4096_p3)
}
 0xc99   : > { %s4100_s26 = scalar_lea.hbm %s6023_s18, 768  ;;  %s4104_s30 = scalar_lea.hbm %s6082_s10, 1536 }
 0xc9a   : > { %p4101_p4 = scmp.ne.s32.totalorder %s6023_s18, %s4100_s26  ;;  %p4105_p9 = scmp.lt.s32.totalorder %s6023_s18, %s6082_s10 }
 0xc9b   : > { %p4106_p10 = scmp.lt.s32.totalorder %s4104_s30, %s4100_s26 }
 0xc9c   : > { %p4102_p7 = pnand %p4101_p4, %p4250_p5 }
 0xc9d   : > { %p4107_p11 = por %p4106_p10, %p4105_p9 }
 0xc9e   : > { %p4103_p8 = pneg %p4102_p7 }
 0xca0   : > { %p4108_p12 = pnand %p4107_p11, %p4103_p8 }
 0xca2   : > { %4111 = shalt.err (!%p4108_p12)
}
 0xca3   : > { %s4155_s29 = smov 384   ;;  %s4156_s21 = smov 24  }
 0xca4   : > { %3947 = dma.vmem_to_hbm [thread:$0]  (%p4250_p5), %s6025_s11, 768, %s6023_s18, %s6032_s17, %s4155_s29, %s4155_s29, %s4156_s21  }
 0xca5 PF: > { %p3953_p13 = scmp.ge.s32.totalorder %s4146_s16, 2  ;;  %s3296_s25 = sand.u32 1, %s4134_s13  }
 0xca6   : > { %s3297_s20 = scalar_lea.sflag [#allocation3], %s3296_s25 }
 0xca7   : > { %p3950_p0 = pnand %p3953_p13, %p4254_p6 }
 0xca9   : > { %p3951_p1 = pneg %p3950_p0 }
 0xcab   : > { %4129 = dma.done.wait (%p3951_p1), %s3297_s20, 768  }
 0xcac   : > { %4131 = vsyncadd (%p3951_p1), %s3297_s20, 4294966528  ;;  %s6088_s26 = sld [smem:[#allocation5_spill]]  ;;  %p20_p2 = scmp.ge.s32.totalorder %s4237_s19, 4  }
 0xcad   : > { %s6089_s13 = smov %s4138_s14  ;;  %s6090_s14 = smov %s4142_s15 }
 0xcae   : > { %s6092_s16 = smov %s4237_s19  ;;  %22 = sbr.rel (!%p20_p2) target bundleno = 3 (0x3), region = 95 }
 0xcb2   : > { %s6091_s15 = smov %s6088_s26 }
 0xcb3   :  { %3302 = vsyncpa [#allocation3], 1 }
 0xcb4   :  { %3304 = vsyncpa [#allocation3 + $0x1], 1 }

</bundles_post_ra>
